<compile_context>
chip_gen: v5e
topology: v5e:2x2
jax: 0.10.0
libtpu: 0.0.40
codegen_flags: <defaults>
</compile_context>

<pallas_src>
import functools

import jax
import jax.numpy as jnp
from jax.experimental import pallas as pl
from jax.experimental.pallas import tpu as pltpu

NEG_SLOPE = 0.01   # nn.LeakyReLU default negative_slope
LANE = 128
SUBLANE = 8


def _round_up(x, m):
    return (x + m - 1) // m * m


def _num_tensorcores():
    """Heuristic: v7x has 2 TensorCores/chip (megacore); v5e/v6e have 1."""
    try:
        kind = jax.devices()[0].device_kind.lower()
    except Exception:
        return 1
    return 2 if "v7" in kind else 1


def _pick_batch_tile(batch, block_batch, n_cores):
    """Batch tile (multiple of 8) and padded batch (multiple of the tile)."""
    bp0 = _round_up(batch, SUBLANE)
    tb = min(_round_up(block_batch, SUBLANE), bp0)
    if n_cores > 1:
        # Keep >= n_cores grid steps so dimension_semantics=("parallel",)
        # actually shards the batch axis across TensorCores (v7x).
        tb = min(tb, _round_up(pl.cdiv(bp0, n_cores), SUBLANE))
    bp = _round_up(bp0, tb)
    return tb, bp


# --------------------------------------------------------------------------
# Kernel: one batch tile through the whole (pair-composed) network.
# --------------------------------------------------------------------------
def _sparse_triangular_kernel(x_ref, w_ref, b_ref, o_ref, xpad_ref, *,
                              n_feat, n_pad, compute_dtype):
    # x_ref   : (TB, N)      f32          batch tile, unpadded feature lanes
    # w_ref   : (4, NP, NP)  f32|bf16     pair-composed weights, (in, out)
    # b_ref   : (4, 1, NP)   f32          pair-composed biases
    # o_ref   : (TB, N)      f32
    # xpad_ref: (TB, NP)     f32|bf16     lane-padded activation scratch
    if n_pad > n_feat:
        # Lane-pad the input inside VMEM (avoids a wrapper-side HBM pad pass).
        # Re-zeroed every step: cheap, and stays correct under megacore
        # sharding where a core may never execute grid step 0.
        xpad_ref[...] = jnp.zeros_like(xpad_ref)
        xpad_ref[:, :n_feat] = x_ref[...].astype(compute_dtype)
        h = xpad_ref[...]
    else:
        h = x_ref[...].astype(compute_dtype)

    for pair in range(4):                         # static unroll, 4 matmuls
        w = w_ref[pair]                           # (NP, NP), static index
        h = jnp.dot(h, w, preferred_element_type=jnp.float32) + b_ref[pair]
        if pair < 3:                              # LeakyReLU after pairs 1..3 only
            h = jnp.maximum(h, NEG_SLOPE * h).astype(compute_dtype)

    o_ref[...] = h[:, :n_feat]                    # h is f32 here


# --------------------------------------------------------------------------
# Parameter glue (plain JAX, done once): re-apply the triangular masks,
# compose each Upper->Lower pair, pre-transpose to (in, out), lane-pad.
# --------------------------------------------------------------------------
def prepare_params(weights, biases, layer_size, *, use_bf16=True):
    """weights: (8, N, N) f32 in PyTorch (out, in) layout; biases: (8, N) f32.

    Even layers (0,2,4,6) are Upper-triangular, odd layers Lower-triangular;
    masks are re-applied here so raw unmasked nn.Linear weights also work.
    Returns (W: (4, NP, NP) in f32 or bf16, B: (4, 1, NP) f32).
    """
    N = layer_size
    NP = _round_up(N, LANE)
    ws, bs = [], []
    for k in range(4):
        wu = jnp.triu(weights[2 * k])             # Upper layer weight
        wl = jnp.tril(weights[2 * k + 1])         # Lower layer weight
        bu, bl = biases[2 * k], biases[2 * k + 1]
        # (x @ Wu.T + bu) @ Wl.T + bl == x @ (Wu.T @ Wl.T) + (bu @ Wl.T + bl)
        ws.append(wu.T @ wl.T)                    # (N, N), (in, out) layout
        bs.append(bu @ wl.T + bl)                 # (N,)
    W = jnp.stack(ws, axis=0)
    B = jnp.stack(bs, axis=0)
    W = jnp.pad(W, ((0, 0), (0, NP - N), (0, NP - N)))
    B = jnp.pad(B, ((0, 0), (0, NP - N))).reshape(4, 1, NP)
    w_dtype = jnp.bfloat16 if use_bf16 else jnp.float32
    return W.astype(w_dtype), B.astype(jnp.float32)


# --------------------------------------------------------------------------
# Wrapper: batch-tiled pallas_call, composed weights resident in VMEM.
# --------------------------------------------------------------------------
def sparse_triangular_network(x, w_packed, b_packed, *, block_batch=512):
    """x: (B, N) f32; w_packed/b_packed from prepare_params."""
    Bsz, N = x.shape
    NP = w_packed.shape[-1]
    compute_dtype = w_packed.dtype
    w_itemsize = jnp.dtype(compute_dtype).itemsize

    tb, Bp = _pick_batch_tile(Bsz, block_batch, _num_tensorcores())

    xp = x.astype(jnp.float32)
    if Bp != Bsz:
        xp = jnp.pad(xp, ((0, Bp - Bsz), (0, 0)))    # row pad only (cheap/rare)

    kernel = functools.partial(
        _sparse_triangular_kernel,
        n_feat=N, n_pad=NP, compute_dtype=compute_dtype)

    # Advisory cost of the *unpadded* problem (4 composed matmuls).
    cost = pl.CostEstimate(
        flops=2 * Bsz * N * N * 4,
        transcendentals=0,
        bytes_accessed=(Bsz * N * 4 + w_packed.size * w_itemsize
                        + b_packed.size * 4 + Bsz * N * 4),
    )

    def run(single_buffer_weights):
        wbuf = 1 if single_buffer_weights else 2
        const_kwargs = (dict(pipeline_mode=pl.Buffered(buffer_count=1))
                        if single_buffer_weights else {})
        # Resident VMEM footprint (blocks are lane-padded to 128 internally).
        vmem_needed = (wbuf * 4 * NP * NP * w_itemsize        # weights
                       + wbuf * 4 * LANE * 4                  # biases
                       + 2 * tb * NP * 4                      # x tiles
                       + 2 * tb * NP * 4                      # out tiles
                       + tb * NP * w_itemsize)                # pad scratch
        vmem_limit = max(16 << 20,
                         min(int(1.25 * vmem_needed) + (1 << 20), 120 << 20))
        return pl.pallas_call(
            kernel,
            out_shape=jax.ShapeDtypeStruct((Bp, N), jnp.float32),
            grid=(Bp // tb,),
            in_specs=[
                pl.BlockSpec((tb, N), lambda i: (i, 0)),          # batch tile
                pl.BlockSpec((4, NP, NP), lambda i: (0, 0, 0),    # weights
                             **const_kwargs),
                pl.BlockSpec((4, 1, NP), lambda i: (0, 0, 0),     # biases
                             **const_kwargs),
            ],
            out_specs=pl.BlockSpec((tb, N), lambda i: (i, 0)),
            scratch_shapes=[pltpu.VMEM((tb, NP), compute_dtype)],
            compiler_params=pltpu.CompilerParams(
                dimension_semantics=("parallel",),                # megacore
                vmem_limit_bytes=vmem_limit),
            cost_estimate=cost,
        )(xp, w_packed, b_packed)

    try:
        out = run(single_buffer_weights=True)
    except Exception:
        # pipeline_mode=pl.Buffered(1) unsupported on this jax version ->
        # fall back to the default double-buffered (equally correct) path.
        out = run(single_buffer_weights=False)

    return out if Bp == Bsz else out[:Bsz]


# --------------------------------------------------------------------------
# Init + pure-JAX reference of the ORIGINAL 8-layer forward (for checking).
# --------------------------------------------------------------------------
def init_params(key, layer_size):
    """Synthetic init mimicking nn.Linear's U(-1/sqrt(N), 1/sqrt(N)) + tri mask."""
    bound = 1.0 / jnp.sqrt(layer_size)
    ws, bs = [], []
    for i in range(8):
        kw, kb, key = jax.random.split(key, 3)
        w = jax.random.uniform(kw, (layer_size, layer_size), jnp.float32,
                               minval=-bound, maxval=bound)
        b = jax.random.uniform(kb, (layer_size,), jnp.float32,
                               minval=-bound, maxval=bound)
        w = jnp.triu(w) if i % 2 == 0 else jnp.tril(w)
        ws.append(w)
        bs.append(b)
    return jnp.stack(ws, axis=0), jnp.stack(bs, axis=0)


def reference_forward(x, weights, biases):
    out = x
    for pair in range(4):
        for k in (2 * pair, 2 * pair + 1):
            out = out @ weights[k].T + biases[k]
        if pair < 3:
            out = jnp.where(out > 0, out, NEG_SLOPE * out)
    return out


if __name__ == "__main__":
    layer_size = 32
    batch = 256

    key = jax.random.PRNGKey(0)
    kx, kp = jax.random.split(key)
    x = jax.random.normal(kx, (batch, layer_size), jnp.float32)
    weights, biases = init_params(kp, layer_size)
    ref = reference_forward(x, weights, biases)

    # f32 weights: tight agreement (pair composition only reassociates sums).
    w32, b32 = prepare_params(weights, biases, layer_size, use_bf16=False)
    out32 = jax.block_until_ready(sparse_triangular_network(x, w32, b32))
    assert out32.shape == (batch, layer_size)
    assert jnp.allclose(out32, ref, atol=1e-3, rtol=1e-3), "f32 mismatch vs reference"

    # bf16 weights/activations (default): half the weight DMA/VMEM, MXU-native
    # on v5e/v6e/v7x; tolerance loosened for the bf16 casts.
    wbf, bbf = prepare_params(weights, biases, layer_size)   # use_bf16=True
    outbf = jax.block_until_ready(sparse_triangular_network(x, wbf, bbf))
    assert outbf.shape == (batch, layer_size)
    assert jnp.allclose(outbf, ref, atol=5e-2, rtol=5e-2), "bf16 mismatch vs reference"

    print("KERNEL_OK")
</pallas_src>

<mosaic_0001>
module attributes {stable_mosaic.version = 11 : i64} {
  func.func @_sparse_triangular_kernel(%arg0: i32, %arg1: memref<256x32xf32, #tpu.memory_space<vmem>>, %arg2: memref<4x128x128xf32, #tpu.memory_space<vmem>>, %arg3: memref<4x1x128xf32, #tpu.memory_space<vmem>>, %arg4: memref<256x32xf32, #tpu.memory_space<vmem>>, %arg5: memref<256x128xf32, #tpu.memory_space<vmem>>) attributes {dimension_semantics = [#tpu.dimension_semantics<parallel>], iteration_bounds = array<i64: 1>, scalar_prefetch = 0 : i64, scratch_operands = 1 : i64, tpu.core_type = #tpu.core_type<tc>, window_params = [{transform_indices = @transform_0, window_bounds = array<i64: 256, 32>}, {pipeline_mode = #tpu.pipeline_mode<synchronous>, transform_indices = @transform_1, window_bounds = array<i64: 4, 128, 128>}, {pipeline_mode = #tpu.pipeline_mode<synchronous>, transform_indices = @transform_2, window_bounds = array<i64: 4, 1, 128>}, {transform_indices = @transform_3, window_bounds = array<i64: 256, 32>}]} {
    %cst = arith.constant 0.000000e+00 : f32
    %0 = vector.broadcast %cst : f32 to vector<256x128xf32>
    %c0 = arith.constant 0 : index
    %c0_0 = arith.constant 0 : index
    %1 = vector.load %arg5[%c0, %c0_0] : memref<256x128xf32, #tpu.memory_space<vmem>>, vector<256x128xf32>
    tpu.vector_store %arg5[%c0, %c0_0], %0 {strides = array<i32>} : memref<256x128xf32, #tpu.memory_space<vmem>>, vector<256x128xf32>,
    %c0_1 = arith.constant 0 : index
    %c0_2 = arith.constant 0 : index
    %2 = vector.load %arg1[%c0_1, %c0_2] : memref<256x32xf32, #tpu.memory_space<vmem>>, vector<256x32xf32>
    %c0_3 = arith.constant 0 : index
    %c0_4 = arith.constant 0 : index
    %3 = vector.load %arg5[%c0_3, %c0_4] : memref<256x128xf32, #tpu.memory_space<vmem>>, vector<256x32xf32>
    tpu.vector_store %arg5[%c0_3, %c0_4], %2 {strides = array<i32>} : memref<256x128xf32, #tpu.memory_space<vmem>>, vector<256x32xf32>,
    %c0_5 = arith.constant 0 : index
    %c0_6 = arith.constant 0 : index
    %4 = vector.load %arg5[%c0_5, %c0_6] : memref<256x128xf32, #tpu.memory_space<vmem>>, vector<256x128xf32>
    %c0_7 = arith.constant 0 : index
    %c0_8 = arith.constant 0 : index
    %c0_9 = arith.constant 0 : index
    %5 = vector.load %arg2[%c0_7, %c0_8, %c0_9] : memref<4x128x128xf32, #tpu.memory_space<vmem>>, vector<1x128x128xf32>
    %6 = vector.shape_cast %5 : vector<1x128x128xf32> to vector<128x128xf32>
    %cst_10 = arith.constant dense<0.000000e+00> : vector<256x128xf32>
    %7 = tpu.matmul %4, %6, %cst_10 {dimension_numbers = #tpu.dot_dimension_numbers<[1], [0], [0], [1], [0, 0, 1, 1], [], []>} : vector<256x128xf32>, vector<128x128xf32>, vector<256x128xf32> -> vector<256x128xf32>
    %c0_11 = arith.constant 0 : index
    %c0_12 = arith.constant 0 : index
    %c0_13 = arith.constant 0 : index
    %8 = vector.load %arg3[%c0_11, %c0_12, %c0_13] : memref<4x1x128xf32, #tpu.memory_space<vmem>>, vector<1x1x128xf32>
    %9 = vector.shape_cast %8 : vector<1x1x128xf32> to vector<1x128xf32>
    %10 = vector.broadcast %9 : vector<1x128xf32> to vector<256x128xf32>
    %11 = arith.addf %7, %10 : vector<256x128xf32>
    %cst_14 = arith.constant 0.00999999977 : f32
    %12 = vector.broadcast %cst_14 : f32 to vector<256x128xf32>
    %13 = arith.mulf %12, %11 : vector<256x128xf32>
    %14 = arith.maximumf %11, %13 : vector<256x128xf32>
    %c1 = arith.constant 1 : index
    %c0_15 = arith.constant 0 : index
    %c0_16 = arith.constant 0 : index
    %15 = vector.load %arg2[%c1, %c0_15, %c0_16] : memref<4x128x128xf32, #tpu.memory_space<vmem>>, vector<1x128x128xf32>
    %16 = vector.shape_cast %15 : vector<1x128x128xf32> to vector<128x128xf32>
    %cst_17 = arith.constant dense<0.000000e+00> : vector<256x128xf32>
    %17 = tpu.matmul %14, %16, %cst_17 {dimension_numbers = #tpu.dot_dimension_numbers<[1], [0], [0], [1], [0, 0, 1, 1], [], []>} : vector<256x128xf32>, vector<128x128xf32>, vector<256x128xf32> -> vector<256x128xf32>
    %c1_18 = arith.constant 1 : index
    %c0_19 = arith.constant 0 : index
    %c0_20 = arith.constant 0 : index
    %18 = vector.load %arg3[%c1_18, %c0_19, %c0_20] : memref<4x1x128xf32, #tpu.memory_space<vmem>>, vector<1x1x128xf32>
    %19 = vector.shape_cast %18 : vector<1x1x128xf32> to vector<1x128xf32>
    %20 = vector.broadcast %19 : vector<1x128xf32> to vector<256x128xf32>
    %21 = arith.addf %17, %20 : vector<256x128xf32>
    %cst_21 = arith.constant 0.00999999977 : f32
    %22 = vector.broadcast %cst_21 : f32 to vector<256x128xf32>
    %23 = arith.mulf %22, %21 : vector<256x128xf32>
    %24 = arith.maximumf %21, %23 : vector<256x128xf32>
    %c2 = arith.constant 2 : index
    %c0_22 = arith.constant 0 : index
    %c0_23 = arith.constant 0 : index
    %25 = vector.load %arg2[%c2, %c0_22, %c0_23] : memref<4x128x128xf32, #tpu.memory_space<vmem>>, vector<1x128x128xf32>
    %26 = vector.shape_cast %25 : vector<1x128x128xf32> to vector<128x128xf32>
    %cst_24 = arith.constant dense<0.000000e+00> : vector<256x128xf32>
    %27 = tpu.matmul %24, %26, %cst_24 {dimension_numbers = #tpu.dot_dimension_numbers<[1], [0], [0], [1], [0, 0, 1, 1], [], []>} : vector<256x128xf32>, vector<128x128xf32>, vector<256x128xf32> -> vector<256x128xf32>
    %c2_25 = arith.constant 2 : index
    %c0_26 = arith.constant 0 : index
    %c0_27 = arith.constant 0 : index
    %28 = vector.load %arg3[%c2_25, %c0_26, %c0_27] : memref<4x1x128xf32, #tpu.memory_space<vmem>>, vector<1x1x128xf32>
    %29 = vector.shape_cast %28 : vector<1x1x128xf32> to vector<1x128xf32>
    %30 = vector.broadcast %29 : vector<1x128xf32> to vector<256x128xf32>
    %31 = arith.addf %27, %30 : vector<256x128xf32>
    %cst_28 = arith.constant 0.00999999977 : f32
    %32 = vector.broadcast %cst_28 : f32 to vector<256x128xf32>
    %33 = arith.mulf %32, %31 : vector<256x128xf32>
    %34 = arith.maximumf %31, %33 : vector<256x128xf32>
    %c3 = arith.constant 3 : index
    %c0_29 = arith.constant 0 : index
    %c0_30 = arith.constant 0 : index
    %35 = vector.load %arg2[%c3, %c0_29, %c0_30] : memref<4x128x128xf32, #tpu.memory_space<vmem>>, vector<1x128x128xf32>
    %36 = vector.shape_cast %35 : vector<1x128x128xf32> to vector<128x128xf32>
    %cst_31 = arith.constant dense<0.000000e+00> : vector<256x128xf32>
    %37 = tpu.matmul %34, %36, %cst_31 {dimension_numbers = #tpu.dot_dimension_numbers<[1], [0], [0], [1], [0, 0, 1, 1], [], []>} : vector<256x128xf32>, vector<128x128xf32>, vector<256x128xf32> -> vector<256x128xf32>
    %c3_32 = arith.constant 3 : index
    %c0_33 = arith.constant 0 : index
    %c0_34 = arith.constant 0 : index
    %38 = vector.load %arg3[%c3_32, %c0_33, %c0_34] : memref<4x1x128xf32, #tpu.memory_space<vmem>>, vector<1x1x128xf32>
    %39 = vector.shape_cast %38 : vector<1x1x128xf32> to vector<1x128xf32>
    %40 = vector.broadcast %39 : vector<1x128xf32> to vector<256x128xf32>
    %41 = arith.addf %37, %40 : vector<256x128xf32>
    %42 = vector.extract_strided_slice %41 {offsets = [0, 0], sizes = [256, 32], strides = [1, 1]} : vector<256x128xf32> to vector<256x32xf32>
    %c0_35 = arith.constant 0 : index
    %c0_36 = arith.constant 0 : index
    %43 = vector.load %arg4[%c0_35, %c0_36] : memref<256x32xf32, #tpu.memory_space<vmem>>, vector<256x32xf32>
    tpu.vector_store %arg4[%c0_35, %c0_36], %42 {strides = array<i32>} : memref<256x32xf32, #tpu.memory_space<vmem>>, vector<256x32xf32>,
    return
  }
  func.func @transform_0(%arg0: i32) -> (i32, i32) {
    %c0_i32 = arith.constant 0 : i32
    %c0_i32_0 = arith.constant 0 : i32
    return %arg0, %c0_i32 : i32, i32
  }
  func.func @transform_1(%arg0: i32) -> (i32, i32, i32) {
    %c0_i32 = arith.constant 0 : i32
    %c0_i32_0 = arith.constant 0 : i32
    %c0_i32_1 = arith.constant 0 : i32
    %c0_i32_2 = arith.constant 0 : i32
    return %c0_i32, %c0_i32_0, %c0_i32_1 : i32, i32, i32
  }
  func.func @transform_2(%arg0: i32) -> (i32, i32, i32) {
    %c0_i32 = arith.constant 0 : i32
    %c0_i32_0 = arith.constant 0 : i32
    %c0_i32_1 = arith.constant 0 : i32
    %c0_i32_2 = arith.constant 0 : i32
    return %c0_i32, %c0_i32_0, %c0_i32_1 : i32, i32, i32
  }
  func.func @transform_3(%arg0: i32) -> (i32, i32) {
    %c0_i32 = arith.constant 0 : i32
    %c0_i32_0 = arith.constant 0 : i32
    return %arg0, %c0_i32 : i32, i32
  }
}

module attributes {stable_mosaic.version = 11 : i64} {
  func.func @_sparse_triangular_kernel(%arg0: i32, %arg1: memref<256x32xf32, #tpu.memory_space<vmem>>, %arg2: memref<4x128x128xf32, #tpu.memory_space<vmem>>, %arg3: memref<4x1x128xf32, #tpu.memory_space<vmem>>, %arg4: memref<256x32xf32, #tpu.memory_space<vmem>>, %arg5: memref<256x128xf32, #tpu.memory_space<vmem>>) attributes {dimension_semantics = [#tpu.dimension_semantics<parallel>], iteration_bounds = array<i64: 1>, scalar_prefetch = 0 : i64, scratch_operands = 1 : i64, tpu.core_type = #tpu.core_type<tc>, window_params = [{transform_indices = @transform_0, window_bounds = array<i64: 256, 32>}, {pipeline_mode = #tpu.pipeline_mode<synchronous>, transform_indices = @transform_1, window_bounds = array<i64: 4, 128, 128>}, {pipeline_mode = #tpu.pipeline_mode<synchronous>, transform_indices = @transform_2, window_bounds = array<i64: 4, 1, 128>}, {transform_indices = @transform_3, window_bounds = array<i64: 256, 32>}]} {
    %cst = arith.constant 0.000000e+00 : f32
    %0 = vector.broadcast %cst : f32 to vector<256x128xf32>
    %c0 = arith.constant 0 : index
    %c0_0 = arith.constant 0 : index
    %1 = vector.load %arg5[%c0, %c0_0] : memref<256x128xf32, #tpu.memory_space<vmem>>, vector<256x128xf32>
    tpu.vector_store %arg5[%c0, %c0_0], %0 {strides = array<i32>} : memref<256x128xf32, #tpu.memory_space<vmem>>, vector<256x128xf32>,
    %c0_1 = arith.constant 0 : index
    %c0_2 = arith.constant 0 : index
    %2 = vector.load %arg1[%c0_1, %c0_2] : memref<256x32xf32, #tpu.memory_space<vmem>>, vector<256x32xf32>
    %c0_3 = arith.constant 0 : index
    %c0_4 = arith.constant 0 : index
    %3 = vector.load %arg5[%c0_3, %c0_4] : memref<256x128xf32, #tpu.memory_space<vmem>>, vector<256x32xf32>
    tpu.vector_store %arg5[%c0_3, %c0_4], %2 {strides = array<i32>} : memref<256x128xf32, #tpu.memory_space<vmem>>, vector<256x32xf32>,
    %c0_5 = arith.constant 0 : index
    %c0_6 = arith.constant 0 : index
    %4 = vector.load %arg5[%c0_5, %c0_6] : memref<256x128xf32, #tpu.memory_space<vmem>>, vector<256x128xf32>
    %c0_7 = arith.constant 0 : index
    %c0_8 = arith.constant 0 : index
    %c0_9 = arith.constant 0 : index
    %5 = vector.load %arg2[%c0_7, %c0_8, %c0_9] : memref<4x128x128xf32, #tpu.memory_space<vmem>>, vector<1x128x128xf32>
    %6 = vector.shape_cast %5 : vector<1x128x128xf32> to vector<128x128xf32>
    %cst_10 = arith.constant dense<0.000000e+00> : vector<256x128xf32>
    %7 = tpu.matmul %4, %6, %cst_10 {dimension_numbers = #tpu.dot_dimension_numbers<[1], [0], [0], [1], [0, 0, 1, 1], [], []>} : vector<256x128xf32>, vector<128x128xf32>, vector<256x128xf32> -> vector<256x128xf32>
    %c0_11 = arith.constant 0 : index
    %c0_12 = arith.constant 0 : index
    %c0_13 = arith.constant 0 : index
    %8 = vector.load %arg3[%c0_11, %c0_12, %c0_13] : memref<4x1x128xf32, #tpu.memory_space<vmem>>, vector<1x1x128xf32>
    %9 = vector.shape_cast %8 : vector<1x1x128xf32> to vector<1x128xf32>
    %10 = vector.broadcast %9 : vector<1x128xf32> to vector<256x128xf32>
    %11 = arith.addf %7, %10 : vector<256x128xf32>
    %cst_14 = arith.constant 0.00999999977 : f32
    %12 = vector.broadcast %cst_14 : f32 to vector<256x128xf32>
    %13 = arith.mulf %12, %11 : vector<256x128xf32>
    %14 = arith.maximumf %11, %13 : vector<256x128xf32>
    %c1 = arith.constant 1 : index
    %c0_15 = arith.constant 0 : index
    %c0_16 = arith.constant 0 : index
    %15 = vector.load %arg2[%c1, %c0_15, %c0_16] : memref<4x128x128xf32, #tpu.memory_space<vmem>>, vector<1x128x128xf32>
    %16 = vector.shape_cast %15 : vector<1x128x128xf32> to vector<128x128xf32>
    %cst_17 = arith.constant dense<0.000000e+00> : vector<256x128xf32>
    %17 = tpu.matmul %14, %16, %cst_17 {dimension_numbers = #tpu.dot_dimension_numbers<[1], [0], [0], [1], [0, 0, 1, 1], [], []>} : vector<256x128xf32>, vector<128x128xf32>, vector<256x128xf32> -> vector<256x128xf32>
    %c1_18 = arith.constant 1 : index
    %c0_19 = arith.constant 0 : index
    %c0_20 = arith.constant 0 : index
    %18 = vector.load %arg3[%c1_18, %c0_19, %c0_20] : memref<4x1x128xf32, #tpu.memory_space<vmem>>, vector<1x1x128xf32>
    %19 = vector.shape_cast %18 : vector<1x1x128xf32> to vector<1x128xf32>
    %20 = vector.broadcast %19 : vector<1x128xf32> to vector<256x128xf32>
    %21 = arith.addf %17, %20 : vector<256x128xf32>
    %cst_21 = arith.constant 0.00999999977 : f32
    %22 = vector.broadcast %cst_21 : f32 to vector<256x128xf32>
    %23 = arith.mulf %22, %21 : vector<256x128xf32>
    %24 = arith.maximumf %21, %23 : vector<256x128xf32>
    %c2 = arith.constant 2 : index
    %c0_22 = arith.constant 0 : index
    %c0_23 = arith.constant 0 : index
    %25 = vector.load %arg2[%c2, %c0_22, %c0_23] : memref<4x128x128xf32, #tpu.memory_space<vmem>>, vector<1x128x128xf32>
    %26 = vector.shape_cast %25 : vector<1x128x128xf32> to vector<128x128xf32>
    %cst_24 = arith.constant dense<0.000000e+00> : vector<256x128xf32>
    %27 = tpu.matmul %24, %26, %cst_24 {dimension_numbers = #tpu.dot_dimension_numbers<[1], [0], [0], [1], [0, 0, 1, 1], [], []>} : vector<256x128xf32>, vector<128x128xf32>, vector<256x128xf32> -> vector<256x128xf32>
    %c2_25 = arith.constant 2 : index
    %c0_26 = arith.constant 0 : index
    %c0_27 = arith.constant 0 : index
    %28 = vector.load %arg3[%c2_25, %c0_26, %c0_27] : memref<4x1x128xf32, #tpu.memory_space<vmem>>, vector<1x1x128xf32>
    %29 = vector.shape_cast %28 : vector<1x1x128xf32> to vector<1x128xf32>
    %30 = vector.broadcast %29 : vector<1x128xf32> to vector<256x128xf32>
    %31 = arith.addf %27, %30 : vector<256x128xf32>
    %cst_28 = arith.constant 0.00999999977 : f32
    %32 = vector.broadcast %cst_28 : f32 to vector<256x128xf32>
    %33 = arith.mulf %32, %31 : vector<256x128xf32>
    %34 = arith.maximumf %31, %33 : vector<256x128xf32>
    %c3 = arith.constant 3 : index
    %c0_29 = arith.constant 0 : index
    %c0_30 = arith.constant 0 : index
    %35 = vector.load %arg2[%c3, %c0_29, %c0_30] : memref<4x128x128xf32, #tpu.memory_space<vmem>>, vector<1x128x128xf32>
    %36 = vector.shape_cast %35 : vector<1x128x128xf32> to vector<128x128xf32>
    %cst_31 = arith.constant dense<0.000000e+00> : vector<256x128xf32>
    %37 = tpu.matmul %34, %36, %cst_31 {dimension_numbers = #tpu.dot_dimension_numbers<[1], [0], [0], [1], [0, 0, 1, 1], [], []>} : vector<256x128xf32>, vector<128x128xf32>, vector<256x128xf32> -> vector<256x128xf32>
    %c3_32 = arith.constant 3 : index
    %c0_33 = arith.constant 0 : index
    %c0_34 = arith.constant 0 : index
    %38 = vector.load %arg3[%c3_32, %c0_33, %c0_34] : memref<4x1x128xf32, #tpu.memory_space<vmem>>, vector<1x1x128xf32>
    %39 = vector.shape_cast %38 : vector<1x1x128xf32> to vector<1x128xf32>
    %40 = vector.broadcast %39 : vector<1x128xf32> to vector<256x128xf32>
    %41 = arith.addf %37, %40 : vector<256x128xf32>
    %42 = vector.extract_strided_slice %41 {offsets = [0, 0], sizes = [256, 32], strides = [1, 1]} : vector<256x128xf32> to vector<256x32xf32>
    %c0_35 = arith.constant 0 : index
    %c0_36 = arith.constant 0 : index
    %43 = vector.load %arg4[%c0_35, %c0_36] : memref<256x32xf32, #tpu.memory_space<vmem>>, vector<256x32xf32>
    tpu.vector_store %arg4[%c0_35, %c0_36], %42 {strides = array<i32>} : memref<256x32xf32, #tpu.memory_space<vmem>>, vector<256x32xf32>,
    return
  }
  func.func @transform_0(%arg0: i32) -> (i32, i32) {
    %c0_i32 = arith.constant 0 : i32
    %c0_i32_0 = arith.constant 0 : i32
    return %arg0, %c0_i32 : i32, i32
  }
  func.func @transform_1(%arg0: i32) -> (i32, i32, i32) {
    %c0_i32 = arith.constant 0 : i32
    %c0_i32_0 = arith.constant 0 : i32
    %c0_i32_1 = arith.constant 0 : i32
    %c0_i32_2 = arith.constant 0 : i32
    return %c0_i32, %c0_i32_0, %c0_i32_1 : i32, i32, i32
  }
  func.func @transform_2(%arg0: i32) -> (i32, i32, i32) {
    %c0_i32 = arith.constant 0 : i32
    %c0_i32_0 = arith.constant 0 : i32
    %c0_i32_1 = arith.constant 0 : i32
    %c0_i32_2 = arith.constant 0 : i32
    return %c0_i32, %c0_i32_0, %c0_i32_1 : i32, i32, i32
  }
  func.func @transform_3(%arg0: i32) -> (i32, i32) {
    %c0_i32 = arith.constant 0 : i32
    %c0_i32_0 = arith.constant 0 : i32
    return %arg0, %c0_i32 : i32, i32
  }
}

</mosaic_0001>

<bundles_post_ra>
// kernel: tpu_custom_call.1
= control target key start
LH: loop header
LB: loop body
LE: loop exit
PB: predicated region body
PF: predicated region fallthrough
CT: control target
= control target key end

     0   :  { %8 = vsyncpa [#allocation4], 0  ;;  %s963_s15 = smov [#allocation3]   ;;  %s964_s17 = smov 128   ;;  %s1426_s0 = inlined_call_operand.vmem [shape: f32[256,32], index: 0, kind: input, shape index: {}]   ;;  %s1427_s1 = inlined_call_operand.hbm [shape: f32[4,128,128], index: 1, kind: input, shape index: {}]   ;;  %s1428_s2 = inlined_call_operand.vmem [shape: f32[4,1,128], index: 2, kind: input, shape index: {}]   ;;  %s1429_s3 = inlined_call_operand.vmem [shape: f32[256,32], index: 3, kind: output, shape index: {}]  }
   0x1   :  { %s15_s14 = sshll.u32 %s1427_s1, 4  ;;  %s17_s16 = sshll.u32 %s963_s15, 4  ;;  %s16_s14 = int_to_ptr.hbm [resolvable:$true] %s15_s14  ;;  %s18_s16 = int_to_ptr.vmem [resolvable:$true] %s17_s16 }
   0x2   :  { %s965_s18 = smov 8  }
   0x3   :  { %23 = dma.hbm_to_vmem [thread:$0]  %s16_s14, 8192, %s18_s16, [#allocation4], %s964_s17, %s964_s17, %s965_s18  }
   0x4   :  { %961 = dma.done.wait [#allocation4], 8192  }
   0x5   :  { %962 = vsyncadd [#allocation4], 4294959104  ;;  %v966_v0 = vmov 0.0   ;;  %v174_v1 = vld [vmem:[#allocation3 + $0x78] sm:$0xff]  ;;  %v173_v2 = vld [vmem:[#allocation3 + $0x70] sm:$0xff]  ;;  %vm94_vm0 = vcmask 261120  }
   0x6   :  { %30 = vst [vmem:[#allocation2] sm:$0xff] %v966_v0  ;;  %179 = vmatpush.msra.mxu0 %v174_v1  ;;  %v172_v3 = vld [vmem:[#allocation3 + $0x68] sm:$0xff]  ;;  %v171_v4 = vld [vmem:[#allocation3 + $0x60] sm:$0xff]  ;;  %v170_v6 = vld [vmem:[#allocation3 + $0x58] sm:$0xff] }
   0x7   :  { %31 = vst [vmem:[#allocation2 + $0x8] sm:$0xff] %v966_v0  ;;  %v62_v5 = vld [vmem:[%s1426_s0] sm:$0xff]  ;;  %v169_v7 = vld [vmem:[#allocation3 + $0x50] sm:$0xff]  ;;  %v168_v8 = vld [vmem:[#allocation3 + $0x48] sm:$0xff] }
   0x8   :  { %32 = vst [vmem:[#allocation2 + $0x10] sm:$0xff] %v966_v0  ;;  %180 = vmatpush.msra.mxu0 %v173_v2  ;;  %v167_v9 = vld [vmem:[#allocation3 + $0x40] sm:$0xff]  ;;  %v166_v10 = vld [vmem:[#allocation3 + $0x38] sm:$0xff]  ;;  %v165_v11 = vld [vmem:[#allocation3 + $0x30] sm:$0xff] }
   0x9   :  { %33 = vst [vmem:[#allocation2 + $0x18] sm:$0xff] %v966_v0  ;;  %v164_v12 = vld [vmem:[#allocation3 + $0x28] sm:$0xff]  ;;  %v163_v13 = vld [vmem:[#allocation3 + $0x20] sm:$0xff]  ;;  %v162_v14 = vld [vmem:[#allocation3 + $0x18] sm:$0xff] }
   0xa   :  { %34 = vst [vmem:[#allocation2 + $0x20] sm:$0xff] %v966_v0  ;;  %181 = vmatpush.msra.mxu0 %v172_v3  ;;  %v161_v15 = vld [vmem:[#allocation3 + $0x10] sm:$0xff]  ;;  %v63_v16 = vld [vmem:[%s1426_s0 + $0x8] sm:$0xff]  ;;  %v65_v19 = vld [vmem:[%s1426_s0 + $0x18] sm:$0xff] }
   0xb   :  { %35 = vst [vmem:[#allocation2 + $0x28] sm:$0xff] %v966_v0  ;;  %v64_v17 = vld [vmem:[%s1426_s0 + $0x10] sm:$0xff]  ;;  %v160_v18 = vld [vmem:[#allocation3 + $0x8] sm:$0xff]  ;;  %v66_v20 = vld [vmem:[%s1426_s0 + $0x20] sm:$0xff] }
   0xc   :  { %36 = vst [vmem:[#allocation2 + $0x30] sm:$0xff] %v966_v0  ;;  %182 = vmatpush.msra.mxu0 %v171_v4  ;;  %v159_v21 = vld [vmem:[#allocation3] sm:$0xff]  ;;  %v67_v23 = vld [vmem:[%s1426_s0 + $0x28] sm:$0xff]  ;;  %v68_v25 = vld [vmem:[%s1426_s0 + $0x30] sm:$0xff] }
   0xd   :  { %37 = vst [vmem:[#allocation2 + $0x38] sm:$0xff] %v966_v0  ;;  %v69_v27 = vld [vmem:[%s1426_s0 + $0x38] sm:$0xff]  ;;  %v70_v29 = vld [vmem:[%s1426_s0 + $0x40] sm:$0xff]  ;;  %v71_v31 = vld [vmem:[%s1426_s0 + $0x48] sm:$0xff] }
   0xe   :  { %38 = vst [vmem:[#allocation2 + $0x40] sm:$0xff] %v966_v0  ;;  %183 = vmatpush.msra.mxu0 %v170_v6  ;;  %v72_v33 = vld [vmem:[%s1426_s0 + $0x50] sm:$0xff]  ;;  %v73_v35 = vld [vmem:[%s1426_s0 + $0x58] sm:$0xff]  ;;  %v74_v37 = vld [vmem:[%s1426_s0 + $0x60] sm:$0xff] }
   0xf   :  { %39 = vst [vmem:[#allocation2 + $0x48] sm:$0xff] %v966_v0  ;;  %v75_v39 = vld [vmem:[%s1426_s0 + $0x68] sm:$0xff]  ;;  %v372_v40 = vld [vmem:[#allocation3 + $0xf8] sm:$0xff]  ;;  %v371_v41 = vld [vmem:[#allocation3 + $0xf0] sm:$0xff] }
  0x10   :  { %40 = vst [vmem:[#allocation2 + $0x50] sm:$0xff] %v966_v0  ;;  %184 = vmatpush.msra.mxu0 %v169_v7  ;;  %378 = vmatpush.msra.mxu1 %v372_v40  ;;  %v76_v43 = vld [vmem:[%s1426_s0 + $0x70] sm:$0xff]  ;;  %v370_v44 = vld [vmem:[#allocation3 + $0xe8] sm:$0xff]  ;;  %v369_v45 = vld [vmem:[#allocation3 + $0xe0] sm:$0xff] }
  0x11   :  { %41 = vst [vmem:[#allocation2 + $0x58] sm:$0xff] %v966_v0  ;;  %v368_v46 = vld [vmem:[#allocation3 + $0xd8] sm:$0xff]  ;;  %v367_v47 = vld [vmem:[#allocation3 + $0xd0] sm:$0xff]  ;;  %v366_v50 = vld [vmem:[#allocation3 + $0xc8] sm:$0xff] }
  0x12   :  { %95 = vst.msk [vmem:[#allocation2] sm:$0xff] %vm94_vm0, %v62_v5  ;;  %185 = vmatpush.msra.mxu0 %v168_v8  ;;  %379 = vmatpush.msra.mxu1 %v371_v41  ;;  %v77_v49 = vld [vmem:[%s1426_s0 + $0x78] sm:$0xff]  ;;  %v365_v51 = vld [vmem:[#allocation3 + $0xc0] sm:$0xff]  ;;  %v363_v53 = vld [vmem:[#allocation3 + $0xb0] sm:$0xff] }
  0x13   :  { %42 = vst [vmem:[#allocation2 + $0x60] sm:$0xff] %v966_v0  ;;  %v364_v52 = vld [vmem:[#allocation3 + $0xb8] sm:$0xff]  ;;  %v78_v55 = vld [vmem:[%s1426_s0 + $0x80] sm:$0xff]  ;;  %v362_v56 = vld [vmem:[#allocation3 + $0xa8] sm:$0xff] }
  0x14   :  { %43 = vst [vmem:[#allocation2 + $0x68] sm:$0xff] %v966_v0  ;;  %186 = vmatpush.msra.mxu0 %v167_v9  ;;  %380 = vmatpush.msra.mxu1 %v370_v44  ;;  %v361_v57 = vld [vmem:[#allocation3 + $0xa0] sm:$0xff]  ;;  %v360_v58 = vld [vmem:[#allocation3 + $0x98] sm:$0xff]  ;;  %v359_v60 = vld [vmem:[#allocation3 + $0x90] sm:$0xff] }
  0x15   :  { %44 = vst [vmem:[#allocation2 + $0x70] sm:$0xff] %v966_v0  ;;  %v79_v61 = vld [vmem:[%s1426_s0 + $0x88] sm:$0xff]  ;;  %v357_v63 = vld [vmem:[#allocation3 + $0x80] sm:$0xff]  ;;  %v80_v1 = vld [vmem:[%s1426_s0 + $0x90] sm:$0xff] }
  0x16   :  { %45 = vst [vmem:[#allocation2 + $0x78] sm:$0xff] %v966_v0  ;;  %187 = vmatpush.msra.mxu0 %v166_v10  ;;  %381 = vmatpush.msra.mxu1 %v369_v45  ;;  %v358_v62 = vld [vmem:[#allocation3 + $0x88] sm:$0xff]  ;;  %v81_v3 = vld [vmem:[%s1426_s0 + $0x98] sm:$0xff]  ;;  %v82_v5 = vld [vmem:[%s1426_s0 + $0xa0] sm:$0xff] }
  0x17   :  { %46 = vst [vmem:[#allocation2 + $0x80] sm:$0xff] %v966_v0  ;;  %v1109_v6 = vld [vmem:[%s1428_s2] ss:$0 sm:$0xff]  ;;  %v83_v10 = vld [vmem:[%s1426_s0 + $0xa8] sm:$0xff]  ;;  %v88_v40 = vld [vmem:[%s1426_s0 + $0xd0] sm:$0xff] }
  0x18   :  { %47 = vst [vmem:[#allocation2 + $0x88] sm:$0xff] %v966_v0  ;;  %188 = vmatpush.msra.mxu0 %v165_v11  ;;  %382 = vmatpush.msra.mxu1 %v368_v46  ;;  %v89_v46 = vld [vmem:[%s1426_s0 + $0xd8] sm:$0xff] }
  0x19   :  { %48 = vst [vmem:[#allocation2 + $0x90] sm:$0xff] %v966_v0  ;;  %v127_v22 = vld [vmem:[#allocation2] sm:$0xff] }
  0x1a   :  { %49 = vst [vmem:[#allocation2 + $0x98] sm:$0xff] %v966_v0  ;;  %189 = vmatpush.msra.mxu0 %v164_v12  ;;  %383 = vmatpush.msra.mxu1 %v367_v47 }
  0x1b   :  { %50 = vst [vmem:[#allocation2 + $0xa0] sm:$0xff] %v966_v0 }
  0x1c   :  { %51 = vst [vmem:[#allocation2 + $0xa8] sm:$0xff] %v966_v0  ;;  %190 = vmatpush.msra.mxu0 %v163_v13  ;;  %384 = vmatpush.msra.mxu1 %v366_v50 }
  0x1d   :  { %52 = vst [vmem:[#allocation2 + $0xb0] sm:$0xff] %v966_v0 }
  0x1e   :  { %53 = vst [vmem:[#allocation2 + $0xb8] sm:$0xff] %v966_v0  ;;  %191 = vmatpush.msra.mxu0 %v162_v14  ;;  %385 = vmatpush.msra.mxu1 %v365_v51 }
  0x1f   :  { %54 = vst [vmem:[#allocation2 + $0xc0] sm:$0xff] %v966_v0 }
  0x20   :  { %55 = vst [vmem:[#allocation2 + $0xc8] sm:$0xff] %v966_v0  ;;  %192 = vmatpush.msra.mxu0 %v161_v15  ;;  %386 = vmatpush.msra.mxu1 %v364_v52  ;;  %v90_v52 = vld [vmem:[%s1426_s0 + $0xe0] sm:$0xff] }
  0x21   :  { %56 = vst [vmem:[#allocation2 + $0xd0] sm:$0xff] %v966_v0 }
  0x22   :  { %57 = vst [vmem:[#allocation2 + $0xd8] sm:$0xff] %v966_v0  ;;  %193 = vmatpush.msra.mxu0 %v160_v18  ;;  %387 = vmatpush.msra.mxu1 %v363_v53 }
  0x23   :  { %58 = vst [vmem:[#allocation2 + $0xe0] sm:$0xff] %v966_v0 }
  0x24   :  { %59 = vst [vmem:[#allocation2 + $0xe8] sm:$0xff] %v966_v0  ;;  %194 = vmatpush.msra.mxu0 %v159_v21  ;;  %388 = vmatpush.msra.mxu1 %v362_v56 }
  0x25   :  { %60 = vst [vmem:[#allocation2 + $0xf0] sm:$0xff] %v966_v0  ;;  %195 = vmatmul.f32.vlgmr.msra.gmra.mxu0 %v127_v22  ;;  %v85_v22 = vld [vmem:[%s1426_s0 + $0xb8] sm:$0xff] }
  0x26   :  { %61 = vst [vmem:[#allocation2 + $0xf8] sm:$0xff] %v966_v0  ;;  %389 = vmatpush.msra.mxu1 %v361_v57 }
  0x27   :  { %96 = vst.msk [vmem:[#allocation2 + $0x8] sm:$0xff] %vm94_vm0, %v63_v16  ;;  %v84_v16 = vld [vmem:[%s1426_s0 + $0xb0] sm:$0xff] }
  0x28   :  { %97 = vst.msk [vmem:[#allocation2 + $0x10] sm:$0xff] %vm94_vm0, %v64_v17  ;;  %390 = vmatpush.msra.mxu1 %v360_v58  ;;  %v91_v58 = vld [vmem:[%s1426_s0 + $0xe8] sm:$0xff] }
  0x29   :  { %98 = vst.msk [vmem:[#allocation2 + $0x18] sm:$0xff] %vm94_vm0, %v65_v19 }
  0x2a   :  { %99 = vst.msk [vmem:[#allocation2 + $0x20] sm:$0xff] %vm94_vm0, %v66_v20  ;;  %391 = vmatpush.msra.mxu1 %v359_v60 }
  0x2b   :  { %100 = vst.msk [vmem:[#allocation2 + $0x28] sm:$0xff] %vm94_vm0, %v67_v23 }
  0x2c   :  { %101 = vst.msk [vmem:[#allocation2 + $0x30] sm:$0xff] %vm94_vm0, %v68_v25  ;;  %392 = vmatpush.msra.mxu1 %v358_v62 }
  0x2d   :  { %102 = vst.msk [vmem:[#allocation2 + $0x38] sm:$0xff] %vm94_vm0, %v69_v27 }
  0x2e   :  { %v128_v24 = vld [vmem:[#allocation2 + $0x8] sm:$0xff]  ;;  %103 = vst.msk [vmem:[#allocation2 + $0x40] sm:$0xff] %vm94_vm0, %v70_v29  ;;  %393 = vmatpush.msra.mxu1 %v357_v63 }
  0x2f   :  { %198 = vmatmul.f32.gmra.mxu0 %v128_v24  ;;  %v129_v26 = vld [vmem:[#allocation2 + $0x10] sm:$0xff]  ;;  %104 = vst.msk [vmem:[#allocation2 + $0x48] sm:$0xff] %vm94_vm0, %v71_v31 }
  0x30   :  { %v130_v28 = vld [vmem:[#allocation2 + $0x18] sm:$0xff]  ;;  %105 = vst.msk [vmem:[#allocation2 + $0x50] sm:$0xff] %vm94_vm0, %v72_v33 }
  0x31   :  { %v131_v30 = vld [vmem:[#allocation2 + $0x20] sm:$0xff]  ;;  %106 = vst.msk [vmem:[#allocation2 + $0x58] sm:$0xff] %vm94_vm0, %v73_v35 }
  0x32   :  { %v132_v32 = vld [vmem:[#allocation2 + $0x28] sm:$0xff]  ;;  %107 = vst.msk [vmem:[#allocation2 + $0x60] sm:$0xff] %vm94_vm0, %v74_v37 }
  0x33   :  { %v133_v34 = vld [vmem:[#allocation2 + $0x30] sm:$0xff]  ;;  %108 = vst.msk [vmem:[#allocation2 + $0x68] sm:$0xff] %vm94_vm0, %v75_v39 }
  0x34   :  { %v134_v36 = vld [vmem:[#allocation2 + $0x38] sm:$0xff]  ;;  %109 = vst.msk [vmem:[#allocation2 + $0x70] sm:$0xff] %vm94_vm0, %v76_v43 }
  0x35   :  { %v135_v38 = vld [vmem:[#allocation2 + $0x40] sm:$0xff]  ;;  %110 = vst.msk [vmem:[#allocation2 + $0x78] sm:$0xff] %vm94_vm0, %v77_v49 }
  0x36   :  { %v136_v42 = vld [vmem:[#allocation2 + $0x48] sm:$0xff]  ;;  %111 = vst.msk [vmem:[#allocation2 + $0x80] sm:$0xff] %vm94_vm0, %v78_v55 }
  0x37   :  { %201 = vmatmul.f32.gmra.mxu0 %v129_v26  ;;  %v137_v48 = vld [vmem:[#allocation2 + $0x50] sm:$0xff]  ;;  %112 = vst.msk [vmem:[#allocation2 + $0x88] sm:$0xff] %vm94_vm0, %v79_v61 }
  0x38   :  { %v138_v54 = vld [vmem:[#allocation2 + $0x58] sm:$0xff]  ;;  %113 = vst.msk [vmem:[#allocation2 + $0x90] sm:$0xff] %vm94_vm0, %v80_v1 }
  0x39   :  { %v139_v59 = vld [vmem:[#allocation2 + $0x60] sm:$0xff]  ;;  %114 = vst.msk [vmem:[#allocation2 + $0x98] sm:$0xff] %vm94_vm0, %v81_v3  ;;  %v570_v3 = vld [vmem:[#allocation3 + $0x170] sm:$0xff] }
  0x3a   :  { %v140_v0 = vld [vmem:[#allocation2 + $0x68] sm:$0xff]  ;;  %115 = vst.msk [vmem:[#allocation2 + $0xa0] sm:$0xff] %vm94_vm0, %v82_v5 }
  0x3b   :  { %v141_v2 = vld [vmem:[#allocation2 + $0x70] sm:$0xff]  ;;  %116 = vst.msk [vmem:[#allocation2 + $0xa8] sm:$0xff] %vm94_vm0, %v83_v10  ;;  %v569_v5 = vld [vmem:[#allocation3 + $0x168] sm:$0xff]  ;;  %v568_v10 = vld [vmem:[#allocation3 + $0x160] sm:$0xff] }
  0x3c   :  { %v142_v4 = vld [vmem:[#allocation2 + $0x78] sm:$0xff]  ;;  %117 = vst.msk [vmem:[#allocation2 + $0xb0] sm:$0xff] %vm94_vm0, %v84_v16  ;;  %v565_v16 = vld [vmem:[#allocation3 + $0x148] sm:$0xff] }
  0x3d   :  { %v143_v8 = vld [vmem:[#allocation2 + $0x80] sm:$0xff]  ;;  %118 = vst.msk [vmem:[#allocation2 + $0xb8] sm:$0xff] %vm94_vm0, %v85_v22  ;;  %v563_v22 = vld [vmem:[#allocation3 + $0x138] sm:$0xff] }
  0x3e   :  { %v144_v14 = vld [vmem:[#allocation2 + $0x88] sm:$0xff]  ;;  %121 = vst.msk [vmem:[#allocation2 + $0xd0] sm:$0xff] %vm94_vm0, %v88_v40 }
  0x3f   :  { %204 = vmatmul.f32.gmra.mxu0 %v130_v28  ;;  %v145_v20 = vld [vmem:[#allocation2 + $0x90] sm:$0xff]  ;;  %v86_v28 = vld [vmem:[%s1426_s0 + $0xc0] sm:$0xff]  ;;  %122 = vst.msk [vmem:[#allocation2 + $0xd8] sm:$0xff] %vm94_vm0, %v89_v46 }
  0x40   :  { %v146_v26 = vld [vmem:[#allocation2 + $0x98] sm:$0xff]  ;;  %119 = vst.msk [vmem:[#allocation2 + $0xc0] sm:$0xff] %vm94_vm0, %v86_v28 }
  0x41   :  { %123 = vst.msk [vmem:[#allocation2 + $0xe0] sm:$0xff] %vm94_vm0, %v90_v52 }
  0x42   :  { %124 = vst.msk [vmem:[#allocation2 + $0xe8] sm:$0xff] %vm94_vm0, %v91_v58 }
  0x43   :  { %v149_v44 = vld [vmem:[#allocation2 + $0xb0] sm:$0xff] }
  0x44   :  { %v150_v50 = vld [vmem:[#allocation2 + $0xb8] sm:$0xff] }
  0x47   :  { %207 = vmatmul.f32.gmra.mxu0 %v131_v30  ;;  %v151_v56 = vld [vmem:[#allocation2 + $0xc0] sm:$0xff] }
  0x4f   :  { %210 = vmatmul.f32.gmra.mxu0 %v132_v32  ;;  %v147_v32 = vld [vmem:[#allocation2 + $0xa0] sm:$0xff] }
  0x57   :  { %213 = vmatmul.f32.gmra.mxu0 %v133_v34  ;;  %v87_v34 = vld [vmem:[%s1426_s0 + $0xc8] sm:$0xff] }
  0x58   :  { %120 = vst.msk [vmem:[#allocation2 + $0xc8] sm:$0xff] %vm94_vm0, %v87_v34  ;;  %v557_v34 = vld [vmem:[#allocation3 + $0x108] sm:$0xff] }
  0x5f   :  { %216 = vmatmul.f32.gmra.mxu0 %v134_v36  ;;  %v152_v62 = vld [vmem:[#allocation2 + $0xc8] sm:$0xff] }
  0x67   :  { %219 = vmatmul.f32.gmra.mxu0 %v135_v38  ;;  %v148_v38 = vld [vmem:[#allocation2 + $0xa8] sm:$0xff] }
  0x6f   :  { %222 = vmatmul.f32.gmra.mxu0 %v136_v42 }
  0x77   :  { %225 = vmatmul.f32.gmra.mxu0 %v137_v48 }
  0x7f   :  { %228 = vmatmul.f32.gmra.mxu0 %v138_v54 }
  0x87   :  { %231 = vmatmul.f32.gmra.mxu0 %v139_v59 }
  0x8f   :  { %234 = vmatmul.f32.gmra.mxu0 %v140_v0  ;;  %v92_v0 = vld [vmem:[%s1426_s0 + $0xf0] sm:$0xff] }
  0x90   :  { %125 = vst.msk [vmem:[#allocation2 + $0xf0] sm:$0xff] %vm94_vm0, %v92_v0 }
  0x97   :  { %237 = vmatmul.f32.gmra.mxu0 %v141_v2  ;;  %v571_v2 = vld [vmem:[#allocation3 + $0x178] sm:$0xff] }
  0x98   :  { %577 = vmatpush.msra.mxu2 %v571_v2 }
  0x9a   :  { %578 = vmatpush.msra.mxu2 %v570_v3 }
  0x9c   :  { %579 = vmatpush.msra.mxu2 %v569_v5 }
  0x9e   :  { %580 = vmatpush.msra.mxu2 %v568_v10 }
  0x9f   :  { %240 = vmatmul.f32.gmra.mxu0 %v142_v4 }
  0xa2   :  { %v196_v7 = vpop.f32.mrf.mxu0 }
  0xa3   :  { %v197_v9 = vadd.f32 %v1109_v6, %v196_v7 }
  0xa5   :  { %v292_v11 = vmul.f32 0.01, %v197_v9 }
  0xa7   :  { %243 = vmatmul.f32.gmra.mxu0 %v143_v8  ;;  %v324_v12 = vmax.f32 %v197_v9, %v292_v11  ;;  %v153_v8 = vld [vmem:[#allocation2 + $0xd0] sm:$0xff]  ;;  %v93_v11 = vld [vmem:[%s1426_s0 + $0xf8] sm:$0xff] }
  0xa8   :  { %126 = vst.msk [vmem:[#allocation2 + $0xf8] sm:$0xff] %vm94_vm0, %v93_v11 }
  0xa9   :  { %394 = vmatmul.f32.vlgmr.msra.gmra.mxu1 %v324_v12 }
  0xac   :  { %v199_v13 = vpop.f32.mrf.mxu0 }
  0xad   :  { %v200_v15 = vadd.f32 %v1109_v6, %v199_v13  ;;  %v567_v13 = vld [vmem:[#allocation3 + $0x158] sm:$0xff] }
  0xae   :  { %581 = vmatpush.msra.mxu2 %v567_v13 }
  0xaf   :  { %246 = vmatmul.f32.gmra.mxu0 %v144_v14  ;;  %v293_v17 = vmul.f32 0.01, %v200_v15  ;;  %v566_v14 = vld [vmem:[#allocation3 + $0x150] sm:$0xff] }
  0xb0   :  { %582 = vmatpush.msra.mxu2 %v566_v14 }
  0xb1   :  { %v325_v18 = vmax.f32 %v200_v15, %v293_v17 }
  0xb2   :  { %583 = vmatpush.msra.mxu2 %v565_v16 }
  0xb3   :  { %397 = vmatmul.f32.gmra.mxu1 %v325_v18  ;;  %v154_v18 = vld [vmem:[#allocation2 + $0xd8] sm:$0xff] }
  0xb4   :  { %v202_v19 = vpop.f32.mrf.mxu0 }
  0xb5   :  { %v203_v21 = vadd.f32 %v1109_v6, %v202_v19 }
  0xb7   :  { %249 = vmatmul.f32.gmra.mxu0 %v145_v20  ;;  %v294_v23 = vmul.f32 0.01, %v203_v21  ;;  %v564_v20 = vld [vmem:[#allocation3 + $0x140] sm:$0xff] }
  0xb8   :  { %584 = vmatpush.msra.mxu2 %v564_v20 }
  0xb9   :  { %v326_v24 = vmax.f32 %v203_v21, %v294_v23  ;;  %v562_v23 = vld [vmem:[#allocation3 + $0x130] sm:$0xff] }
  0xba   :  { %585 = vmatpush.msra.mxu2 %v563_v22 }
  0xbb   :  { %400 = vmatmul.f32.gmra.mxu1 %v326_v24 }
  0xbc   :  { %v205_v25 = vpop.f32.mrf.mxu0  ;;  %586 = vmatpush.msra.mxu2 %v562_v23 }
  0xbd   :  { %v206_v27 = vadd.f32 %v1109_v6, %v205_v25  ;;  %v561_v25 = vld [vmem:[#allocation3 + $0x128] sm:$0xff] }
  0xbe   :  { %587 = vmatpush.msra.mxu2 %v561_v25 }
  0xbf   :  { %252 = vmatmul.f32.gmra.mxu0 %v146_v26  ;;  %v295_v29 = vmul.f32 0.01, %v206_v27 }
  0xc1   :  { %v327_v30 = vmax.f32 %v206_v27, %v295_v29  ;;  %v155_v27 = vld [vmem:[#allocation2 + $0xe0] sm:$0xff] }
  0xc2   :  { %v560_v29 = vld [vmem:[#allocation3 + $0x120] sm:$0xff] }
  0xc3   :  { %403 = vmatmul.f32.gmra.mxu1 %v327_v30  ;;  %588 = vmatpush.msra.mxu2 %v560_v29 }
  0xc4   :  { %v208_v31 = vpop.f32.mrf.mxu0 }
  0xc5   :  { %v209_v33 = vadd.f32 %v1109_v6, %v208_v31  ;;  %v559_v31 = vld [vmem:[#allocation3 + $0x118] sm:$0xff] }
  0xc6   :  { %589 = vmatpush.msra.mxu2 %v559_v31 }
  0xc7   :  { %255 = vmatmul.f32.gmra.mxu0 %v147_v32  ;;  %v296_v35 = vmul.f32 0.01, %v209_v33 }
  0xc9   :  { %v328_v36 = vmax.f32 %v209_v33, %v296_v35  ;;  %v558_v33 = vld [vmem:[#allocation3 + $0x110] sm:$0xff] }
  0xca   :  { %590 = vmatpush.msra.mxu2 %v558_v33 }
  0xcb   :  { %406 = vmatmul.f32.gmra.mxu1 %v328_v36  ;;  %v156_v36 = vld [vmem:[#allocation2 + $0xe8] sm:$0xff] }
  0xcc   :  { %v211_v37 = vpop.f32.mrf.mxu0  ;;  %591 = vmatpush.msra.mxu2 %v557_v34 }
  0xcd   :  { %v212_v39 = vadd.f32 %v1109_v6, %v211_v37 }
  0xcf   :  { %258 = vmatmul.f32.gmra.mxu0 %v148_v38  ;;  %v297_v41 = vmul.f32 0.01, %v212_v39  ;;  %v556_v38 = vld [vmem:[#allocation3 + $0x100] sm:$0xff] }
  0xd0   :  { %592 = vmatpush.msra.mxu2 %v556_v38 }
  0xd1   :  { %v329_v42 = vmax.f32 %v212_v39, %v297_v41 }
  0xd3   :  { %409 = vmatmul.f32.gmra.mxu1 %v329_v42  ;;  %v157_v42 = vld [vmem:[#allocation2 + $0xf0] sm:$0xff] }
  0xd4   :  { %v214_v43 = vpop.f32.mrf.mxu0 }
  0xd5   :  { %v215_v45 = vadd.f32 %v1109_v6, %v214_v43 }
  0xd7   :  { %261 = vmatmul.f32.gmra.mxu0 %v149_v44  ;;  %v298_v47 = vmul.f32 0.01, %v215_v45 }
  0xd9   :  { %v330_v48 = vmax.f32 %v215_v45, %v298_v47  ;;  %v158_v47 = vld [vmem:[#allocation2 + $0xf8] sm:$0xff] }
  0xdb   :  { %412 = vmatmul.f32.gmra.mxu1 %v330_v48 }
  0xdc   :  { %v217_v49 = vpop.f32.mrf.mxu0 }
  0xdd   :  { %v218_v51 = vadd.f32 %v1109_v6, %v217_v49 }
  0xdf   :  { %264 = vmatmul.f32.gmra.mxu0 %v150_v50  ;;  %v299_v53 = vmul.f32 0.01, %v218_v51 }
  0xe1   :  { %v331_v54 = vmax.f32 %v218_v51, %v299_v53  ;;  %v1175_v53 = vld [vmem:[%s1428_s2 + $0x1] ss:$0 sm:$0xff] }
  0xe3   :  { %415 = vmatmul.f32.gmra.mxu1 %v331_v54 }
  0xe4   :  { %v220_v55 = vpop.f32.mrf.mxu0 }
  0xe5   :  { %v221_v57 = vadd.f32 %v1109_v6, %v220_v55 }
  0xe7   :  { %v300_v59 = vmul.f32 0.01, %v221_v57  ;;  %267 = vmatmul.f32.gmra.mxu0 %v151_v56 }
  0xe9   :  { %v332_v60 = vmax.f32 %v221_v57, %v300_v59 }
  0xeb   :  { %418 = vmatmul.f32.gmra.mxu1 %v332_v60 }
  0xec   :  { %v223_v61 = vpop.f32.mrf.mxu0 }
  0xed   :  { %v224_v63 = vadd.f32 %v1109_v6, %v223_v61 }
  0xef   :  { %v301_v1 = vmul.f32 0.01, %v224_v63  ;;  %270 = vmatmul.f32.gmra.mxu0 %v152_v62 }
  0xf1   :  { %v333_v4 = vmax.f32 %v224_v63, %v301_v1 }
  0xf3   :  { %421 = vmatmul.f32.gmra.mxu1 %v333_v4 }
  0xf4   :  { %v226_v7 = vpop.f32.mrf.mxu0 }
  0xf5   :  { %v227_v9 = vadd.f32 %v1109_v6, %v226_v7 }
  0xf7   :  { %v302_v12 = vmul.f32 0.01, %v227_v9  ;;  %273 = vmatmul.f32.gmra.mxu0 %v153_v8 }
  0xf9   :  { %v334_v15 = vmax.f32 %v227_v9, %v302_v12 }
  0xfb   :  { %424 = vmatmul.f32.gmra.mxu1 %v334_v15 }
  0xfc   :  { %v229_v17 = vpop.f32.mrf.mxu0 }
  0xfd   :  { %v230_v19 = vadd.f32 %v1109_v6, %v229_v17 }
  0xff   :  { %v303_v21 = vmul.f32 0.01, %v230_v19  ;;  %276 = vmatmul.f32.gmra.mxu0 %v154_v18 }
 0x101   :  { %v335_v24 = vmax.f32 %v230_v19, %v303_v21 }
 0x103   :  { %427 = vmatmul.f32.gmra.mxu1 %v335_v24 }
 0x104   :  { %v232_v26 = vpop.f32.mrf.mxu0 }
 0x105   :  { %v233_v28 = vadd.f32 %v1109_v6, %v232_v26 }
 0x107   :  { %v304_v30 = vmul.f32 0.01, %v233_v28  ;;  %279 = vmatmul.f32.gmra.mxu0 %v155_v27 }
 0x109   :  { %v336_v32 = vmax.f32 %v233_v28, %v304_v30 }
 0x10b   :  { %430 = vmatmul.f32.gmra.mxu1 %v336_v32 }
 0x10c   :  { %v235_v35 = vpop.f32.mrf.mxu0 }
 0x10d   :  { %v236_v37 = vadd.f32 %v1109_v6, %v235_v35 }
 0x10f   :  { %v305_v39 = vmul.f32 0.01, %v236_v37  ;;  %282 = vmatmul.f32.gmra.mxu0 %v156_v36 }
 0x111   :  { %v337_v40 = vmax.f32 %v236_v37, %v305_v39 }
 0x113   :  { %433 = vmatmul.f32.gmra.mxu1 %v337_v40 }
 0x114   :  { %v238_v41 = vpop.f32.mrf.mxu0 }
 0x115   :  { %v239_v43 = vadd.f32 %v1109_v6, %v238_v41 }
 0x117   :  { %v306_v44 = vmul.f32 0.01, %v239_v43  ;;  %285 = vmatmul.f32.gmra.mxu0 %v157_v42 }
 0x119   :  { %v338_v45 = vmax.f32 %v239_v43, %v306_v44 }
 0x11b   :  { %436 = vmatmul.f32.gmra.mxu1 %v338_v45 }
 0x11c   :  { %v241_v46 = vpop.f32.mrf.mxu0 }
 0x11d   :  { %v242_v48 = vadd.f32 %v1109_v6, %v241_v46 }
 0x11f   :  { %v307_v49 = vmul.f32 0.01, %v242_v48  ;;  %288 = vmatmul.f32.gmra.mxu0 %v158_v47 }
 0x121   :  { %v339_v50 = vmax.f32 %v242_v48, %v307_v49 }
 0x123   :  { %439 = vmatmul.f32.gmra.mxu1 %v339_v50 }
 0x124   :  { %v244_v51 = vpop.f32.mrf.mxu0 }
 0x125   :  { %v245_v52 = vadd.f32 %v1109_v6, %v244_v51 }
 0x126   :  { %v395_v55 = vpop.f32.mrf.mxu1 }
 0x127   :  { %v308_v54 = vmul.f32 0.01, %v245_v52  ;;  %v396_v56 = vadd.f32 %v1175_v53, %v395_v55 }
 0x129   :  { %v340_v57 = vmax.f32 %v245_v52, %v308_v54  ;;  %v491_v58 = vmul.f32 0.01, %v396_v56 }
 0x12b   :  { %442 = vmatmul.f32.gmra.mxu1 %v340_v57  ;;  %v523_v61 = vmax.f32 %v396_v56, %v491_v58 }
 0x12c   :  { %v247_v59 = vpop.f32.mrf.mxu0 }
 0x12d   :  { %v248_v60 = vadd.f32 %v1109_v6, %v247_v59  ;;  %593 = vmatmul.f32.vlgmr.msra.gmra.mxu2 %v523_v61 }
 0x12f   :  { %v309_v62 = vmul.f32 0.01, %v248_v60 }
 0x130   :  { %v398_v63 = vpop.f32.mrf.mxu1 }
 0x131   :  { %v399_v0 = vadd.f32 %v1175_v53, %v398_v63  ;;  %v341_v1 = vmax.f32 %v248_v60, %v309_v62 }
 0x133   :  { %445 = vmatmul.f32.gmra.mxu1 %v341_v1  ;;  %v492_v2 = vmul.f32 0.01, %v399_v0 }
 0x134   :  { %v250_v3 = vpop.f32.mrf.mxu0 }
 0x135   :  { %v251_v4 = vadd.f32 %v1109_v6, %v250_v3  ;;  %v524_v5 = vmax.f32 %v399_v0, %v492_v2 }
 0x137   :  { %v310_v7 = vmul.f32 0.01, %v251_v4  ;;  %596 = vmatmul.f32.gmra.mxu2 %v524_v5 }
 0x138   :  { %v401_v8 = vpop.f32.mrf.mxu1 }
 0x139   :  { %v402_v9 = vadd.f32 %v1175_v53, %v401_v8  ;;  %v342_v10 = vmax.f32 %v251_v4, %v310_v7 }
 0x13b   :  { %448 = vmatmul.f32.gmra.mxu1 %v342_v10  ;;  %v493_v11 = vmul.f32 0.01, %v402_v9 }
 0x13c   :  { %v253_v12 = vpop.f32.mrf.mxu0 }
 0x13d   :  { %v254_v13 = vadd.f32 %v1109_v6, %v253_v12  ;;  %v525_v14 = vmax.f32 %v402_v9, %v493_v11 }
 0x13f   :  { %v311_v15 = vmul.f32 0.01, %v254_v13  ;;  %599 = vmatmul.f32.gmra.mxu2 %v525_v14 }
 0x140   :  { %v404_v16 = vpop.f32.mrf.mxu1 }
 0x141   :  { %v405_v17 = vadd.f32 %v1175_v53, %v404_v16  ;;  %v343_v18 = vmax.f32 %v254_v13, %v311_v15  ;;  %v770_v13 = vld [vmem:[#allocation3 + $0x1f8] sm:$0xff]  ;;  %v769_v15 = vld [vmem:[#allocation3 + $0x1f0] sm:$0xff] }
 0x142   :  { %776 = vmatpush.msra.mxu3 %v770_v13 }
 0x143   :  { %451 = vmatmul.f32.gmra.mxu1 %v343_v18  ;;  %v494_v19 = vmul.f32 0.01, %v405_v17 }
 0x144   :  { %v256_v20 = vpop.f32.mrf.mxu0  ;;  %777 = vmatpush.msra.mxu3 %v769_v15 }
 0x145   :  { %v257_v21 = vadd.f32 %v1109_v6, %v256_v20  ;;  %v526_v22 = vmax.f32 %v405_v17, %v494_v19  ;;  %v768_v19 = vld [vmem:[#allocation3 + $0x1e8] sm:$0xff] }
 0x146   :  { %778 = vmatpush.msra.mxu3 %v768_v19 }
 0x147   :  { %v312_v23 = vmul.f32 0.01, %v257_v21  ;;  %602 = vmatmul.f32.gmra.mxu2 %v526_v22 }
 0x148   :  { %v407_v24 = vpop.f32.mrf.mxu1 }
 0x149   :  { %v408_v25 = vadd.f32 %v1175_v53, %v407_v24  ;;  %v344_v26 = vmax.f32 %v257_v21, %v312_v23  ;;  %v767_v21 = vld [vmem:[#allocation3 + $0x1e0] sm:$0xff] }
 0x14a   :  { %779 = vmatpush.msra.mxu3 %v767_v21 }
 0x14b   :  { %454 = vmatmul.f32.gmra.mxu1 %v344_v26  ;;  %v495_v27 = vmul.f32 0.01, %v408_v25 }
 0x14c   :  { %v259_v28 = vpop.f32.mrf.mxu0 }
 0x14d   :  { %v260_v29 = vadd.f32 %v1109_v6, %v259_v28  ;;  %v527_v30 = vmax.f32 %v408_v25, %v495_v27  ;;  %v766_v25 = vld [vmem:[#allocation3 + $0x1d8] sm:$0xff]  ;;  %v765_v27 = vld [vmem:[#allocation3 + $0x1d0] sm:$0xff]  ;;  %v764_v28 = vld [vmem:[#allocation3 + $0x1c8] sm:$0xff] }
 0x14e   :  { %780 = vmatpush.msra.mxu3 %v766_v25 }
 0x14f   :  { %v313_v31 = vmul.f32 0.01, %v260_v29  ;;  %605 = vmatmul.f32.gmra.mxu2 %v527_v30 }
 0x150   :  { %v410_v32 = vpop.f32.mrf.mxu1  ;;  %781 = vmatpush.msra.mxu3 %v765_v27 }
 0x151   :  { %v411_v33 = vadd.f32 %v1175_v53, %v410_v32  ;;  %v345_v34 = vmax.f32 %v260_v29, %v313_v31 }
 0x152   :  { %782 = vmatpush.msra.mxu3 %v764_v28 }
 0x153   :  { %457 = vmatmul.f32.gmra.mxu1 %v345_v34  ;;  %v496_v35 = vmul.f32 0.01, %v411_v33 }
 0x154   :  { %v262_v36 = vpop.f32.mrf.mxu0 }
 0x155   :  { %v263_v37 = vadd.f32 %v1109_v6, %v262_v36  ;;  %v528_v38 = vmax.f32 %v411_v33, %v496_v35  ;;  %v763_v33 = vld [vmem:[#allocation3 + $0x1c0] sm:$0xff] }
 0x156   :  { %783 = vmatpush.msra.mxu3 %v763_v33 }
 0x157   :  { %v314_v39 = vmul.f32 0.01, %v263_v37  ;;  %608 = vmatmul.f32.gmra.mxu2 %v528_v38 }
 0x158   :  { %v413_v40 = vpop.f32.mrf.mxu1 }
 0x159   :  { %v414_v41 = vadd.f32 %v1175_v53, %v413_v40  ;;  %v346_v42 = vmax.f32 %v263_v37, %v314_v39  ;;  %v762_v37 = vld [vmem:[#allocation3 + $0x1b8] sm:$0xff]  ;;  %v761_v39 = vld [vmem:[#allocation3 + $0x1b0] sm:$0xff]  ;;  %v760_v40 = vld [vmem:[#allocation3 + $0x1a8] sm:$0xff] }
 0x15a   :  { %784 = vmatpush.msra.mxu3 %v762_v37 }
 0x15b   :  { %460 = vmatmul.f32.gmra.mxu1 %v346_v42  ;;  %v497_v43 = vmul.f32 0.01, %v414_v41 }
 0x15c   :  { %v265_v44 = vpop.f32.mrf.mxu0  ;;  %785 = vmatpush.msra.mxu3 %v761_v39 }
 0x15d   :  { %v266_v45 = vadd.f32 %v1109_v6, %v265_v44  ;;  %v529_v46 = vmax.f32 %v414_v41, %v497_v43 }
 0x15e   :  { %786 = vmatpush.msra.mxu3 %v760_v40 }
 0x15f   :  { %v315_v47 = vmul.f32 0.01, %v266_v45  ;;  %611 = vmatmul.f32.gmra.mxu2 %v529_v46 }
 0x160   :  { %v416_v48 = vpop.f32.mrf.mxu1 }
 0x161   :  { %v417_v49 = vadd.f32 %v1175_v53, %v416_v48  ;;  %v347_v50 = vmax.f32 %v266_v45, %v315_v47  ;;  %v759_v45 = vld [vmem:[#allocation3 + $0x1a0] sm:$0xff] }
 0x162   :  { %787 = vmatpush.msra.mxu3 %v759_v45 }
 0x163   :  { %463 = vmatmul.f32.gmra.mxu1 %v347_v50  ;;  %v498_v51 = vmul.f32 0.01, %v417_v49 }
 0x164   :  { %v268_v52 = vpop.f32.mrf.mxu0 }
 0x165   :  { %v269_v54 = vadd.f32 %v1109_v6, %v268_v52  ;;  %v530_v55 = vmax.f32 %v417_v49, %v498_v51  ;;  %v758_v49 = vld [vmem:[#allocation3 + $0x198] sm:$0xff]  ;;  %v757_v51 = vld [vmem:[#allocation3 + $0x190] sm:$0xff]  ;;  %v756_v52 = vld [vmem:[#allocation3 + $0x188] sm:$0xff] }
 0x166   :  { %788 = vmatpush.msra.mxu3 %v758_v49 }
 0x167   :  { %v316_v56 = vmul.f32 0.01, %v269_v54  ;;  %614 = vmatmul.f32.gmra.mxu2 %v530_v55 }
 0x168   :  { %v419_v57 = vpop.f32.mrf.mxu1  ;;  %789 = vmatpush.msra.mxu3 %v757_v51 }
 0x169   :  { %v348_v58 = vmax.f32 %v269_v54, %v316_v56  ;;  %v420_v59 = vadd.f32 %v1175_v53, %v419_v57 }
 0x16a   :  { %790 = vmatpush.msra.mxu3 %v756_v52 }
 0x16b   :  { %v499_v60 = vmul.f32 0.01, %v420_v59  ;;  %466 = vmatmul.f32.gmra.mxu1 %v348_v58  ;;  %v755_v58 = vld [vmem:[#allocation3 + $0x180] sm:$0xff] }
 0x16c   :  { %v271_v61 = vpop.f32.mrf.mxu0  ;;  %791 = vmatpush.msra.mxu3 %v755_v58 }
 0x16d   :  { %v272_v62 = vadd.f32 %v1109_v6, %v271_v61  ;;  %v531_v63 = vmax.f32 %v420_v59, %v499_v60 }
 0x16f   :  { %v317_v0 = vmul.f32 0.01, %v272_v62  ;;  %617 = vmatmul.f32.gmra.mxu2 %v531_v63 }
 0x170   :  { %v422_v1 = vpop.f32.mrf.mxu1 }
 0x171   :  { %v349_v2 = vmax.f32 %v272_v62, %v317_v0  ;;  %v423_v3 = vadd.f32 %v1175_v53, %v422_v1 }
 0x173   :  { %v500_v4 = vmul.f32 0.01, %v423_v3  ;;  %469 = vmatmul.f32.gmra.mxu1 %v349_v2 }
 0x174   :  { %v274_v5 = vpop.f32.mrf.mxu0 }
 0x175   :  { %v275_v7 = vadd.f32 %v1109_v6, %v274_v5  ;;  %v532_v8 = vmax.f32 %v423_v3, %v500_v4 }
 0x177   :  { %v318_v9 = vmul.f32 0.01, %v275_v7  ;;  %620 = vmatmul.f32.gmra.mxu2 %v532_v8 }
 0x178   :  { %v425_v10 = vpop.f32.mrf.mxu1 }
 0x179   :  { %v350_v11 = vmax.f32 %v275_v7, %v318_v9  ;;  %v426_v12 = vadd.f32 %v1175_v53, %v425_v10 }
 0x17b   :  { %v501_v14 = vmul.f32 0.01, %v426_v12  ;;  %472 = vmatmul.f32.gmra.mxu1 %v350_v11 }
 0x17c   :  { %v277_v16 = vpop.f32.mrf.mxu0 }
 0x17d   :  { %v278_v17 = vadd.f32 %v1109_v6, %v277_v16  ;;  %v533_v18 = vmax.f32 %v426_v12, %v501_v14 }
 0x17f   :  { %v319_v20 = vmul.f32 0.01, %v278_v17  ;;  %623 = vmatmul.f32.gmra.mxu2 %v533_v18 }
 0x180   :  { %v428_v22 = vpop.f32.mrf.mxu1 }
 0x181   :  { %v351_v23 = vmax.f32 %v278_v17, %v319_v20  ;;  %v429_v24 = vadd.f32 %v1175_v53, %v428_v22 }
 0x183   :  { %v502_v26 = vmul.f32 0.01, %v429_v24  ;;  %475 = vmatmul.f32.gmra.mxu1 %v351_v23 }
 0x184   :  { %v280_v29 = vpop.f32.mrf.mxu0 }
 0x185   :  { %v281_v30 = vadd.f32 %v1109_v6, %v280_v29  ;;  %v534_v31 = vmax.f32 %v429_v24, %v502_v26 }
 0x187   :  { %v320_v32 = vmul.f32 0.01, %v281_v30  ;;  %626 = vmatmul.f32.gmra.mxu2 %v534_v31 }
 0x188   :  { %v431_v34 = vpop.f32.mrf.mxu1 }
 0x189   :  { %v352_v35 = vmax.f32 %v281_v30, %v320_v32  ;;  %v432_v36 = vadd.f32 %v1175_v53, %v431_v34 }
 0x18b   :  { %v503_v38 = vmul.f32 0.01, %v432_v36  ;;  %478 = vmatmul.f32.gmra.mxu1 %v352_v35 }
 0x18c   :  { %v283_v41 = vpop.f32.mrf.mxu0 }
 0x18d   :  { %v284_v42 = vadd.f32 %v1109_v6, %v283_v41  ;;  %v535_v43 = vmax.f32 %v432_v36, %v503_v38 }
 0x18f   :  { %v321_v44 = vmul.f32 0.01, %v284_v42  ;;  %629 = vmatmul.f32.gmra.mxu2 %v535_v43 }
 0x190   :  { %v434_v46 = vpop.f32.mrf.mxu1 }
 0x191   :  { %v353_v47 = vmax.f32 %v284_v42, %v321_v44  ;;  %v435_v48 = vadd.f32 %v1175_v53, %v434_v46 }
 0x193   :  { %v504_v50 = vmul.f32 0.01, %v435_v48  ;;  %481 = vmatmul.f32.gmra.mxu1 %v353_v47 }
 0x194   :  { %v286_v54 = vpop.f32.mrf.mxu0 }
 0x195   :  { %v287_v55 = vadd.f32 %v1109_v6, %v286_v54  ;;  %v536_v56 = vmax.f32 %v435_v48, %v504_v50 }
 0x197   :  { %v322_v57 = vmul.f32 0.01, %v287_v55  ;;  %632 = vmatmul.f32.gmra.mxu2 %v536_v56 }
 0x198   :  { %v437_v59 = vpop.f32.mrf.mxu1 }
 0x199   :  { %v354_v60 = vmax.f32 %v287_v55, %v322_v57  ;;  %v438_v61 = vadd.f32 %v1175_v53, %v437_v59 }
 0x19b   :  { %v505_v62 = vmul.f32 0.01, %v438_v61  ;;  %484 = vmatmul.f32.gmra.mxu1 %v354_v60 }
 0x19c   :  { %v289_v63 = vpop.f32.mrf.mxu0 }
 0x19d   :  { %v290_v0 = vadd.f32 %v1109_v6, %v289_v63  ;;  %v537_v1 = vmax.f32 %v438_v61, %v505_v62  ;;  %v1212_v6 = vld [vmem:[%s1428_s2 + $0x2] ss:$0 sm:$0xff] }
 0x19f   :  { %v323_v2 = vmul.f32 0.01, %v290_v0  ;;  %635 = vmatmul.f32.gmra.mxu2 %v537_v1 }
 0x1a0   :  { %v440_v3 = vpop.f32.mrf.mxu1 }
 0x1a1   :  { %v355_v4 = vmax.f32 %v290_v0, %v323_v2  ;;  %v441_v5 = vadd.f32 %v1175_v53, %v440_v3 }
 0x1a3   :  { %v506_v7 = vmul.f32 0.01, %v441_v5  ;;  %487 = vmatmul.f32.gmra.mxu1 %v355_v4 }
 0x1a5   :  { %v538_v8 = vmax.f32 %v441_v5, %v506_v7 }
 0x1a7   :  { %638 = vmatmul.f32.gmra.mxu2 %v538_v8 }
 0x1a8   :  { %v443_v9 = vpop.f32.mrf.mxu1 }
 0x1a9   :  { %v444_v10 = vadd.f32 %v1175_v53, %v443_v9 }
 0x1ab   :  { %v507_v11 = vmul.f32 0.01, %v444_v10 }
 0x1ad   :  { %v539_v12 = vmax.f32 %v444_v10, %v507_v11 }
 0x1af   :  { %641 = vmatmul.f32.gmra.mxu2 %v539_v12 }
 0x1b0   :  { %v446_v13 = vpop.f32.mrf.mxu1  ;;  %v594_v15 = vpop.f32.mrf.mxu2 }
 0x1b1   :  { %v447_v14 = vadd.f32 %v1175_v53, %v446_v13  ;;  %v595_v17 = vadd.f32 %v1212_v6, %v594_v15 }
 0x1b3   :  { %v508_v16 = vmul.f32 0.01, %v447_v14  ;;  %v690_v19 = vmul.f32 0.01, %v595_v17 }
 0x1b5   :  { %v540_v18 = vmax.f32 %v447_v14, %v508_v16  ;;  %v722_v20 = vmax.f32 %v595_v17, %v690_v19 }
 0x1b7   :  { %644 = vmatmul.f32.gmra.mxu2 %v540_v18  ;;  %792 = vmatmul.f32.vlgmr.msra.gmra.mxu3 %v722_v20 }
 0x1b8   :  { %v449_v21 = vpop.f32.mrf.mxu1 }
 0x1b9   :  { %v450_v22 = vadd.f32 %v1175_v53, %v449_v21 }
 0x1ba   :  { %v597_v23 = vpop.f32.mrf.mxu2 }
 0x1bb   :  { %v509_v24 = vmul.f32 0.01, %v450_v22  ;;  %v598_v25 = vadd.f32 %v1212_v6, %v597_v23 }
 0x1bd   :  { %v541_v26 = vmax.f32 %v450_v22, %v509_v24  ;;  %v691_v27 = vmul.f32 0.01, %v598_v25 }
 0x1bf   :  { %647 = vmatmul.f32.gmra.mxu2 %v541_v26  ;;  %v723_v28 = vmax.f32 %v598_v25, %v691_v27 }
 0x1c0   :  { %v452_v29 = vpop.f32.mrf.mxu1 }
 0x1c1   :  { %v453_v30 = vadd.f32 %v1175_v53, %v452_v29  ;;  %795 = vmatmul.f32.gmra.mxu3 %v723_v28 }
 0x1c2   :  { %v600_v31 = vpop.f32.mrf.mxu2 }
 0x1c3   :  { %v510_v32 = vmul.f32 0.01, %v453_v30  ;;  %v601_v33 = vadd.f32 %v1212_v6, %v600_v31 }
 0x1c5   :  { %v542_v34 = vmax.f32 %v453_v30, %v510_v32  ;;  %v692_v35 = vmul.f32 0.01, %v601_v33 }
 0x1c7   :  { %650 = vmatmul.f32.gmra.mxu2 %v542_v34  ;;  %v724_v36 = vmax.f32 %v601_v33, %v692_v35 }
 0x1c8   :  { %v455_v37 = vpop.f32.mrf.mxu1 }
 0x1c9   :  { %v456_v38 = vadd.f32 %v1175_v53, %v455_v37  ;;  %798 = vmatmul.f32.gmra.mxu3 %v724_v36 }
 0x1ca   :  { %v603_v39 = vpop.f32.mrf.mxu2 }
 0x1cb   :  { %v511_v40 = vmul.f32 0.01, %v456_v38  ;;  %v604_v41 = vadd.f32 %v1212_v6, %v603_v39 }
 0x1cd   :  { %v543_v42 = vmax.f32 %v456_v38, %v511_v40  ;;  %v693_v43 = vmul.f32 0.01, %v604_v41 }
 0x1cf   :  { %653 = vmatmul.f32.gmra.mxu2 %v543_v42  ;;  %v725_v44 = vmax.f32 %v604_v41, %v693_v43 }
 0x1d0   :  { %v458_v45 = vpop.f32.mrf.mxu1 }
 0x1d1   :  { %v459_v46 = vadd.f32 %v1175_v53, %v458_v45  ;;  %801 = vmatmul.f32.gmra.mxu3 %v725_v44 }
 0x1d2   :  { %v606_v47 = vpop.f32.mrf.mxu2 }
 0x1d3   :  { %v512_v48 = vmul.f32 0.01, %v459_v46  ;;  %v607_v49 = vadd.f32 %v1212_v6, %v606_v47 }
 0x1d5   :  { %v544_v50 = vmax.f32 %v459_v46, %v512_v48  ;;  %v694_v51 = vmul.f32 0.01, %v607_v49 }
 0x1d7   :  { %656 = vmatmul.f32.gmra.mxu2 %v544_v50  ;;  %v726_v52 = vmax.f32 %v607_v49, %v694_v51 }
 0x1d8   :  { %v461_v54 = vpop.f32.mrf.mxu1 }
 0x1d9   :  { %v462_v55 = vadd.f32 %v1175_v53, %v461_v54  ;;  %804 = vmatmul.f32.gmra.mxu3 %v726_v52 }
 0x1da   :  { %v609_v56 = vpop.f32.mrf.mxu2 }
 0x1db   :  { %v513_v57 = vmul.f32 0.01, %v462_v55  ;;  %v610_v58 = vadd.f32 %v1212_v6, %v609_v56 }
 0x1dd   :  { %v545_v59 = vmax.f32 %v462_v55, %v513_v57  ;;  %v695_v60 = vmul.f32 0.01, %v610_v58 }
 0x1df   :  { %659 = vmatmul.f32.gmra.mxu2 %v545_v59  ;;  %v727_v61 = vmax.f32 %v610_v58, %v695_v60 }
 0x1e0   :  { %v464_v62 = vpop.f32.mrf.mxu1 }
 0x1e1   :  { %v465_v63 = vadd.f32 %v1175_v53, %v464_v62  ;;  %807 = vmatmul.f32.gmra.mxu3 %v727_v61 }
 0x1e2   :  { %v612_v0 = vpop.f32.mrf.mxu2 }
 0x1e3   :  { %v514_v1 = vmul.f32 0.01, %v465_v63  ;;  %v613_v2 = vadd.f32 %v1212_v6, %v612_v0 }
 0x1e5   :  { %v546_v3 = vmax.f32 %v465_v63, %v514_v1  ;;  %v696_v4 = vmul.f32 0.01, %v613_v2 }
 0x1e7   :  { %662 = vmatmul.f32.gmra.mxu2 %v546_v3  ;;  %v728_v5 = vmax.f32 %v613_v2, %v696_v4 }
 0x1e8   :  { %v467_v7 = vpop.f32.mrf.mxu1 }
 0x1e9   :  { %v468_v8 = vadd.f32 %v1175_v53, %v467_v7  ;;  %810 = vmatmul.f32.gmra.mxu3 %v728_v5 }
 0x1ea   :  { %v615_v9 = vpop.f32.mrf.mxu2 }
 0x1eb   :  { %v515_v10 = vmul.f32 0.01, %v468_v8  ;;  %v616_v11 = vadd.f32 %v1212_v6, %v615_v9 }
 0x1ed   :  { %v547_v12 = vmax.f32 %v468_v8, %v515_v10  ;;  %v697_v13 = vmul.f32 0.01, %v616_v11 }
 0x1ef   :  { %665 = vmatmul.f32.gmra.mxu2 %v547_v12  ;;  %v729_v14 = vmax.f32 %v616_v11, %v697_v13 }
 0x1f0   :  { %v470_v15 = vpop.f32.mrf.mxu1 }
 0x1f1   :  { %v471_v16 = vadd.f32 %v1175_v53, %v470_v15  ;;  %813 = vmatmul.f32.gmra.mxu3 %v729_v14 }
 0x1f2   :  { %v618_v17 = vpop.f32.mrf.mxu2 }
 0x1f3   :  { %v516_v18 = vmul.f32 0.01, %v471_v16  ;;  %v619_v19 = vadd.f32 %v1212_v6, %v618_v17 }
 0x1f5   :  { %v548_v20 = vmax.f32 %v471_v16, %v516_v18  ;;  %v698_v21 = vmul.f32 0.01, %v619_v19  ;;  %v1249_v16 = vld [vmem:[%s1428_s2 + $0x3] ss:$0 sm:$0xff] }
 0x1f7   :  { %668 = vmatmul.f32.gmra.mxu2 %v548_v20  ;;  %v730_v22 = vmax.f32 %v619_v19, %v698_v21 }
 0x1f8   :  { %v473_v23 = vpop.f32.mrf.mxu1 }
 0x1f9   :  { %v474_v24 = vadd.f32 %v1175_v53, %v473_v23  ;;  %816 = vmatmul.f32.gmra.mxu3 %v730_v22 }
 0x1fa   :  { %v621_v25 = vpop.f32.mrf.mxu2 }
 0x1fb   :  { %v517_v26 = vmul.f32 0.01, %v474_v24  ;;  %v622_v27 = vadd.f32 %v1212_v6, %v621_v25 }
 0x1fd   :  { %v549_v28 = vmax.f32 %v474_v24, %v517_v26  ;;  %v699_v29 = vmul.f32 0.01, %v622_v27 }
 0x1ff   :  { %671 = vmatmul.f32.gmra.mxu2 %v549_v28  ;;  %v731_v30 = vmax.f32 %v622_v27, %v699_v29 }
 0x200   :  { %v476_v31 = vpop.f32.mrf.mxu1 }
 0x201   :  { %v477_v32 = vadd.f32 %v1175_v53, %v476_v31  ;;  %819 = vmatmul.f32.gmra.mxu3 %v731_v30 }
 0x202   :  { %v624_v33 = vpop.f32.mrf.mxu2 }
 0x203   :  { %v518_v34 = vmul.f32 0.01, %v477_v32  ;;  %v625_v35 = vadd.f32 %v1212_v6, %v624_v33 }
 0x205   :  { %v550_v36 = vmax.f32 %v477_v32, %v518_v34  ;;  %v700_v37 = vmul.f32 0.01, %v625_v35 }
 0x207   :  { %674 = vmatmul.f32.gmra.mxu2 %v550_v36  ;;  %v732_v38 = vmax.f32 %v625_v35, %v700_v37 }
 0x208   :  { %v479_v39 = vpop.f32.mrf.mxu1 }
 0x209   :  { %v480_v40 = vadd.f32 %v1175_v53, %v479_v39  ;;  %822 = vmatmul.f32.gmra.mxu3 %v732_v38 }
 0x20a   :  { %v627_v41 = vpop.f32.mrf.mxu2 }
 0x20b   :  { %v519_v42 = vmul.f32 0.01, %v480_v40  ;;  %v628_v43 = vadd.f32 %v1212_v6, %v627_v41 }
 0x20d   :  { %v551_v44 = vmax.f32 %v480_v40, %v519_v42  ;;  %v701_v45 = vmul.f32 0.01, %v628_v43 }
 0x20f   :  { %677 = vmatmul.f32.gmra.mxu2 %v551_v44  ;;  %v733_v46 = vmax.f32 %v628_v43, %v701_v45 }
 0x210   :  { %v482_v47 = vpop.f32.mrf.mxu1 }
 0x211   :  { %v483_v48 = vadd.f32 %v1175_v53, %v482_v47  ;;  %825 = vmatmul.f32.gmra.mxu3 %v733_v46 }
 0x212   :  { %v630_v49 = vpop.f32.mrf.mxu2 }
 0x213   :  { %v520_v50 = vmul.f32 0.01, %v483_v48  ;;  %v631_v51 = vadd.f32 %v1212_v6, %v630_v49 }
 0x215   :  { %v552_v52 = vmax.f32 %v483_v48, %v520_v50  ;;  %v702_v54 = vmul.f32 0.01, %v631_v51 }
 0x217   :  { %680 = vmatmul.f32.gmra.mxu2 %v552_v52  ;;  %v734_v55 = vmax.f32 %v631_v51, %v702_v54 }
 0x218   :  { %v485_v56 = vpop.f32.mrf.mxu1 }
 0x219   :  { %v486_v57 = vadd.f32 %v1175_v53, %v485_v56  ;;  %828 = vmatmul.f32.gmra.mxu3 %v734_v55 }
 0x21a   :  { %v633_v58 = vpop.f32.mrf.mxu2 }
 0x21b   :  { %v521_v59 = vmul.f32 0.01, %v486_v57  ;;  %v634_v60 = vadd.f32 %v1212_v6, %v633_v58 }
 0x21d   :  { %v553_v61 = vmax.f32 %v486_v57, %v521_v59  ;;  %v703_v62 = vmul.f32 0.01, %v634_v60 }
 0x21f   :  { %683 = vmatmul.f32.gmra.mxu2 %v553_v61  ;;  %v735_v63 = vmax.f32 %v634_v60, %v703_v62 }
 0x220   :  { %v488_v0 = vpop.f32.mrf.mxu1 }
 0x221   :  { %v489_v1 = vadd.f32 %v1175_v53, %v488_v0  ;;  %831 = vmatmul.f32.gmra.mxu3 %v735_v63 }
 0x222   :  { %v636_v2 = vpop.f32.mrf.mxu2 }
 0x223   :  { %v522_v3 = vmul.f32 0.01, %v489_v1  ;;  %v637_v4 = vadd.f32 %v1212_v6, %v636_v2 }
 0x225   :  { %v554_v5 = vmax.f32 %v489_v1, %v522_v3  ;;  %v704_v7 = vmul.f32 0.01, %v637_v4 }
 0x227   :  { %686 = vmatmul.f32.gmra.mxu2 %v554_v5  ;;  %v736_v8 = vmax.f32 %v637_v4, %v704_v7 }
 0x229   :  { %834 = vmatmul.f32.gmra.mxu3 %v736_v8 }
 0x22a   :  { %v639_v9 = vpop.f32.mrf.mxu2 }
 0x22b   :  { %v640_v10 = vadd.f32 %v1212_v6, %v639_v9 }
 0x22d   :  { %v705_v11 = vmul.f32 0.01, %v640_v10 }
 0x22f   :  { %v737_v12 = vmax.f32 %v640_v10, %v705_v11 }
 0x231   :  { %837 = vmatmul.f32.gmra.mxu3 %v737_v12 }
 0x232   :  { %v642_v13 = vpop.f32.mrf.mxu2 }
 0x233   :  { %v643_v14 = vadd.f32 %v1212_v6, %v642_v13 }
 0x235   :  { %v706_v53 = vmul.f32 0.01, %v643_v14 }
 0x237   :  { %v738_v15 = vmax.f32 %v643_v14, %v706_v53 }
 0x239   :  { %840 = vmatmul.f32.gmra.mxu3 %v738_v15 }
 0x23a   :  { %v645_v17 = vpop.f32.mrf.mxu2  ;;  %v793_v19 = vpop.f32.mrf.mxu3 }
 0x23b   :  { %v646_v18 = vadd.f32 %v1212_v6, %v645_v17  ;;  %v794_v21 = vadd.f32 %v1249_v16, %v793_v19 }
 0x23d   :  { %v707_v20 = vmul.f32 0.01, %v646_v18  ;;  %889 = vst.msk [vmem:[%s1429_s3] sm:$0xff] %vm94_vm0, %v794_v21 }
 0x23f   :  { %v739_v22 = vmax.f32 %v646_v18, %v707_v20 }
 0x241   :  { %843 = vmatmul.f32.gmra.mxu3 %v739_v22 }
 0x242   :  { %v648_v23 = vpop.f32.mrf.mxu2 }
 0x243   :  { %v649_v24 = vadd.f32 %v1212_v6, %v648_v23 }
 0x244   :  { %v796_v25 = vpop.f32.mrf.mxu3 }
 0x245   :  { %v708_v26 = vmul.f32 0.01, %v649_v24  ;;  %v797_v27 = vadd.f32 %v1249_v16, %v796_v25 }
 0x247   :  { %890 = vst.msk [vmem:[%s1429_s3 + $0x8] sm:$0xff] %vm94_vm0, %v797_v27  ;;  %v740_v28 = vmax.f32 %v649_v24, %v708_v26 }
 0x249   :  { %846 = vmatmul.f32.gmra.mxu3 %v740_v28 }
 0x24a   :  { %v651_v29 = vpop.f32.mrf.mxu2 }
 0x24b   :  { %v652_v30 = vadd.f32 %v1212_v6, %v651_v29 }
 0x24c   :  { %v799_v31 = vpop.f32.mrf.mxu3 }
 0x24d   :  { %v709_v32 = vmul.f32 0.01, %v652_v30  ;;  %v800_v33 = vadd.f32 %v1249_v16, %v799_v31 }
 0x24f   :  { %891 = vst.msk [vmem:[%s1429_s3 + $0x10] sm:$0xff] %vm94_vm0, %v800_v33  ;;  %v741_v34 = vmax.f32 %v652_v30, %v709_v32 }
 0x251   :  { %849 = vmatmul.f32.gmra.mxu3 %v741_v34 }
 0x252   :  { %v654_v35 = vpop.f32.mrf.mxu2 }
 0x253   :  { %v655_v36 = vadd.f32 %v1212_v6, %v654_v35 }
 0x254   :  { %v802_v37 = vpop.f32.mrf.mxu3 }
 0x255   :  { %v710_v38 = vmul.f32 0.01, %v655_v36  ;;  %v803_v39 = vadd.f32 %v1249_v16, %v802_v37 }
 0x257   :  { %892 = vst.msk [vmem:[%s1429_s3 + $0x18] sm:$0xff] %vm94_vm0, %v803_v39  ;;  %v742_v40 = vmax.f32 %v655_v36, %v710_v38 }
 0x259   :  { %852 = vmatmul.f32.gmra.mxu3 %v742_v40 }
 0x25a   :  { %v657_v41 = vpop.f32.mrf.mxu2 }
 0x25b   :  { %v658_v42 = vadd.f32 %v1212_v6, %v657_v41 }
 0x25c   :  { %v805_v43 = vpop.f32.mrf.mxu3 }
 0x25d   :  { %v711_v44 = vmul.f32 0.01, %v658_v42  ;;  %v806_v45 = vadd.f32 %v1249_v16, %v805_v43 }
 0x25f   :  { %893 = vst.msk [vmem:[%s1429_s3 + $0x20] sm:$0xff] %vm94_vm0, %v806_v45  ;;  %v743_v46 = vmax.f32 %v658_v42, %v711_v44 }
 0x261   :  { %855 = vmatmul.f32.gmra.mxu3 %v743_v46 }
 0x262   :  { %v660_v47 = vpop.f32.mrf.mxu2 }
 0x263   :  { %v661_v48 = vadd.f32 %v1212_v6, %v660_v47 }
 0x264   :  { %v808_v49 = vpop.f32.mrf.mxu3 }
 0x265   :  { %v712_v50 = vmul.f32 0.01, %v661_v48  ;;  %v809_v51 = vadd.f32 %v1249_v16, %v808_v49 }
 0x267   :  { %894 = vst.msk [vmem:[%s1429_s3 + $0x28] sm:$0xff] %vm94_vm0, %v809_v51  ;;  %v744_v52 = vmax.f32 %v661_v48, %v712_v50 }
 0x269   :  { %858 = vmatmul.f32.gmra.mxu3 %v744_v52 }
 0x26a   :  { %v663_v54 = vpop.f32.mrf.mxu2 }
 0x26b   :  { %v664_v55 = vadd.f32 %v1212_v6, %v663_v54 }
 0x26c   :  { %v811_v56 = vpop.f32.mrf.mxu3 }
 0x26d   :  { %v713_v57 = vmul.f32 0.01, %v664_v55  ;;  %v812_v58 = vadd.f32 %v1249_v16, %v811_v56 }
 0x26f   :  { %895 = vst.msk [vmem:[%s1429_s3 + $0x30] sm:$0xff] %vm94_vm0, %v812_v58  ;;  %v745_v59 = vmax.f32 %v664_v55, %v713_v57 }
 0x271   :  { %861 = vmatmul.f32.gmra.mxu3 %v745_v59 }
 0x272   :  { %v666_v60 = vpop.f32.mrf.mxu2 }
 0x273   :  { %v667_v61 = vadd.f32 %v1212_v6, %v666_v60 }
 0x274   :  { %v814_v62 = vpop.f32.mrf.mxu3 }
 0x275   :  { %v714_v63 = vmul.f32 0.01, %v667_v61  ;;  %v815_v0 = vadd.f32 %v1249_v16, %v814_v62 }
 0x277   :  { %v746_v1 = vmax.f32 %v667_v61, %v714_v63  ;;  %896 = vst.msk [vmem:[%s1429_s3 + $0x38] sm:$0xff] %vm94_vm0, %v815_v0 }
 0x279   :  { %864 = vmatmul.f32.gmra.mxu3 %v746_v1 }
 0x27a   :  { %v669_v2 = vpop.f32.mrf.mxu2 }
 0x27b   :  { %v670_v3 = vadd.f32 %v1212_v6, %v669_v2 }
 0x27c   :  { %v817_v4 = vpop.f32.mrf.mxu3 }
 0x27d   :  { %v715_v5 = vmul.f32 0.01, %v670_v3  ;;  %v818_v7 = vadd.f32 %v1249_v16, %v817_v4 }
 0x27f   :  { %v747_v8 = vmax.f32 %v670_v3, %v715_v5  ;;  %897 = vst.msk [vmem:[%s1429_s3 + $0x40] sm:$0xff] %vm94_vm0, %v818_v7 }
 0x281   :  { %867 = vmatmul.f32.gmra.mxu3 %v747_v8 }
 0x282   :  { %v672_v9 = vpop.f32.mrf.mxu2 }
 0x283   :  { %v673_v10 = vadd.f32 %v1212_v6, %v672_v9 }
 0x284   :  { %v820_v11 = vpop.f32.mrf.mxu3 }
 0x285   :  { %v716_v12 = vmul.f32 0.01, %v673_v10  ;;  %v821_v13 = vadd.f32 %v1249_v16, %v820_v11 }
 0x287   :  { %v748_v14 = vmax.f32 %v673_v10, %v716_v12  ;;  %898 = vst.msk [vmem:[%s1429_s3 + $0x48] sm:$0xff] %vm94_vm0, %v821_v13 }
 0x289   :  { %870 = vmatmul.f32.gmra.mxu3 %v748_v14 }
 0x28a   :  { %v675_v53 = vpop.f32.mrf.mxu2 }
 0x28b   :  { %v676_v15 = vadd.f32 %v1212_v6, %v675_v53 }
 0x28c   :  { %v823_v17 = vpop.f32.mrf.mxu3 }
 0x28d   :  { %v717_v18 = vmul.f32 0.01, %v676_v15  ;;  %v824_v19 = vadd.f32 %v1249_v16, %v823_v17 }
 0x28f   :  { %v749_v20 = vmax.f32 %v676_v15, %v717_v18  ;;  %899 = vst.msk [vmem:[%s1429_s3 + $0x50] sm:$0xff] %vm94_vm0, %v824_v19 }
 0x291   :  { %873 = vmatmul.f32.gmra.mxu3 %v749_v20 }
 0x292   :  { %v678_v21 = vpop.f32.mrf.mxu2 }
 0x293   :  { %v679_v22 = vadd.f32 %v1212_v6, %v678_v21 }
 0x294   :  { %v826_v23 = vpop.f32.mrf.mxu3 }
 0x295   :  { %v718_v24 = vmul.f32 0.01, %v679_v22  ;;  %v827_v25 = vadd.f32 %v1249_v16, %v826_v23 }
 0x297   :  { %v750_v26 = vmax.f32 %v679_v22, %v718_v24  ;;  %900 = vst.msk [vmem:[%s1429_s3 + $0x58] sm:$0xff] %vm94_vm0, %v827_v25 }
 0x299   :  { %876 = vmatmul.f32.gmra.mxu3 %v750_v26 }
 0x29a   :  { %v681_v27 = vpop.f32.mrf.mxu2 }
 0x29b   :  { %v682_v28 = vadd.f32 %v1212_v6, %v681_v27 }
 0x29c   :  { %v829_v29 = vpop.f32.mrf.mxu3 }
 0x29d   :  { %v719_v30 = vmul.f32 0.01, %v682_v28  ;;  %v830_v31 = vadd.f32 %v1249_v16, %v829_v29 }
 0x29f   :  { %v751_v32 = vmax.f32 %v682_v28, %v719_v30  ;;  %901 = vst.msk [vmem:[%s1429_s3 + $0x60] sm:$0xff] %vm94_vm0, %v830_v31 }
 0x2a1   :  { %879 = vmatmul.f32.gmra.mxu3 %v751_v32 }
 0x2a2   :  { %v684_v33 = vpop.f32.mrf.mxu2 }
 0x2a3   :  { %v685_v34 = vadd.f32 %v1212_v6, %v684_v33 }
 0x2a4   :  { %v832_v35 = vpop.f32.mrf.mxu3 }
 0x2a5   :  { %v720_v36 = vmul.f32 0.01, %v685_v34  ;;  %v833_v37 = vadd.f32 %v1249_v16, %v832_v35 }
 0x2a7   :  { %v752_v38 = vmax.f32 %v685_v34, %v720_v36  ;;  %902 = vst.msk [vmem:[%s1429_s3 + $0x68] sm:$0xff] %vm94_vm0, %v833_v37 }
 0x2a9   :  { %882 = vmatmul.f32.gmra.mxu3 %v752_v38 }
 0x2aa   :  { %v687_v39 = vpop.f32.mrf.mxu2 }
 0x2ab   :  { %v688_v40 = vadd.f32 %v1212_v6, %v687_v39 }
 0x2ac   :  { %v835_v41 = vpop.f32.mrf.mxu3 }
 0x2ad   :  { %v721_v42 = vmul.f32 0.01, %v688_v40  ;;  %v836_v43 = vadd.f32 %v1249_v16, %v835_v41 }
 0x2af   :  { %v753_v44 = vmax.f32 %v688_v40, %v721_v42  ;;  %903 = vst.msk [vmem:[%s1429_s3 + $0x70] sm:$0xff] %vm94_vm0, %v836_v43 }
 0x2b1   :  { %885 = vmatmul.f32.gmra.mxu3 %v753_v44 }
 0x2b4   :  { %v838_v45 = vpop.f32.mrf.mxu3 }
 0x2b5   :  { %v839_v46 = vadd.f32 %v1249_v16, %v838_v45 }
 0x2b7   :  { %904 = vst.msk [vmem:[%s1429_s3 + $0x78] sm:$0xff] %vm94_vm0, %v839_v46 }
 0x2bc   :  { %v841_v6 = vpop.f32.mrf.mxu3 }
 0x2bd   :  { %v842_v47 = vadd.f32 %v1249_v16, %v841_v6 }
 0x2bf   :  { %905 = vst.msk [vmem:[%s1429_s3 + $0x80] sm:$0xff] %vm94_vm0, %v842_v47 }
 0x2c4   :  { %v844_v48 = vpop.f32.mrf.mxu3 }
 0x2c5   :  { %v845_v49 = vadd.f32 %v1249_v16, %v844_v48 }
 0x2c7   :  { %906 = vst.msk [vmem:[%s1429_s3 + $0x88] sm:$0xff] %vm94_vm0, %v845_v49 }
 0x2cc   :  { %v847_v50 = vpop.f32.mrf.mxu3 }
 0x2cd   :  { %v848_v51 = vadd.f32 %v1249_v16, %v847_v50 }
 0x2cf   :  { %907 = vst.msk [vmem:[%s1429_s3 + $0x90] sm:$0xff] %vm94_vm0, %v848_v51 }
 0x2d4   :  { %v850_v52 = vpop.f32.mrf.mxu3 }
 0x2d5   :  { %v851_v54 = vadd.f32 %v1249_v16, %v850_v52 }
 0x2d7   :  { %908 = vst.msk [vmem:[%s1429_s3 + $0x98] sm:$0xff] %vm94_vm0, %v851_v54 }
 0x2dc   :  { %v853_v55 = vpop.f32.mrf.mxu3 }
 0x2dd   :  { %v854_v56 = vadd.f32 %v1249_v16, %v853_v55 }
 0x2df   :  { %909 = vst.msk [vmem:[%s1429_s3 + $0xa0] sm:$0xff] %vm94_vm0, %v854_v56 }
 0x2e4   :  { %v856_v57 = vpop.f32.mrf.mxu3 }
 0x2e5   :  { %v857_v58 = vadd.f32 %v1249_v16, %v856_v57 }
 0x2e7   :  { %910 = vst.msk [vmem:[%s1429_s3 + $0xa8] sm:$0xff] %vm94_vm0, %v857_v58 }
 0x2ec   :  { %v859_v59 = vpop.f32.mrf.mxu3 }
 0x2ed   :  { %v860_v60 = vadd.f32 %v1249_v16, %v859_v59 }
 0x2ef   :  { %911 = vst.msk [vmem:[%s1429_s3 + $0xb0] sm:$0xff] %vm94_vm0, %v860_v60 }
 0x2f4   :  { %v862_v61 = vpop.f32.mrf.mxu3 }
 0x2f5   :  { %v863_v62 = vadd.f32 %v1249_v16, %v862_v61 }
 0x2f7   :  { %912 = vst.msk [vmem:[%s1429_s3 + $0xb8] sm:$0xff] %vm94_vm0, %v863_v62 }
 0x2fc   :  { %v865_v63 = vpop.f32.mrf.mxu3 }
 0x2fd   :  { %v866_v0 = vadd.f32 %v1249_v16, %v865_v63 }
 0x2ff   :  { %913 = vst.msk [vmem:[%s1429_s3 + $0xc0] sm:$0xff] %vm94_vm0, %v866_v0 }
 0x304   :  { %v868_v1 = vpop.f32.mrf.mxu3 }
 0x305   :  { %v869_v2 = vadd.f32 %v1249_v16, %v868_v1 }
 0x307   :  { %914 = vst.msk [vmem:[%s1429_s3 + $0xc8] sm:$0xff] %vm94_vm0, %v869_v2 }
 0x30c   :  { %v871_v3 = vpop.f32.mrf.mxu3 }
 0x30d   :  { %v872_v4 = vadd.f32 %v1249_v16, %v871_v3 }
 0x30f   :  { %915 = vst.msk [vmem:[%s1429_s3 + $0xd0] sm:$0xff] %vm94_vm0, %v872_v4 }
 0x314   :  { %v874_v5 = vpop.f32.mrf.mxu3 }
 0x315   :  { %v875_v7 = vadd.f32 %v1249_v16, %v874_v5 }
 0x317   :  { %916 = vst.msk [vmem:[%s1429_s3 + $0xd8] sm:$0xff] %vm94_vm0, %v875_v7 }
 0x31c   :  { %v877_v8 = vpop.f32.mrf.mxu3 }
 0x31d   :  { %v878_v9 = vadd.f32 %v1249_v16, %v877_v8 }
 0x31f   :  { %917 = vst.msk [vmem:[%s1429_s3 + $0xe0] sm:$0xff] %vm94_vm0, %v878_v9 }
 0x324   :  { %v880_v10 = vpop.f32.mrf.mxu3 }
 0x325   :  { %v881_v11 = vadd.f32 %v1249_v16, %v880_v10 }
 0x327   :  { %918 = vst.msk [vmem:[%s1429_s3 + $0xe8] sm:$0xff] %vm94_vm0, %v881_v11 }
 0x32c   :  { %v883_v12 = vpop.f32.mrf.mxu3 }
 0x32d   :  { %v884_v13 = vadd.f32 %v1249_v16, %v883_v12 }
 0x32f   :  { %919 = vst.msk [vmem:[%s1429_s3 + $0xf0] sm:$0xff] %vm94_vm0, %v884_v13 }
 0x334   :  { %v886_v14 = vpop.f32.mrf.mxu3 }
 0x335   :  { %v887_v53 = vadd.f32 %v1249_v16, %v886_v14 }
 0x337   :  { %920 = vst.msk [vmem:[%s1429_s3 + $0xf8] sm:$0xff] %vm94_vm0, %v887_v53 }
 0x338   :  { %925 = vsyncpa [#allocation4], 1 }

// kernel: tpu_custom_call.1
= control target key start
LH: loop header
LB: loop body
LE: loop exit
PB: predicated region body
PF: predicated region fallthrough
CT: control target
= control target key end

     0   :  { %8 = vsyncpa [#allocation4], 0  ;;  %s963_s15 = smov [#allocation3]   ;;  %s964_s17 = smov 128   ;;  %s1426_s0 = inlined_call_operand.vmem [shape: f32[256,32], index: 0, kind: input, shape index: {}]   ;;  %s1427_s1 = inlined_call_operand.hbm [shape: f32[4,128,128], index: 1, kind: input, shape index: {}]   ;;  %s1428_s2 = inlined_call_operand.vmem [shape: f32[4,1,128], index: 2, kind: input, shape index: {}]   ;;  %s1429_s3 = inlined_call_operand.vmem [shape: f32[256,32], index: 3, kind: output, shape index: {}]  }
   0x1   :  { %s15_s14 = sshll.u32 %s1427_s1, 4  ;;  %s17_s16 = sshll.u32 %s963_s15, 4  ;;  %s16_s14 = int_to_ptr.hbm [resolvable:$true] %s15_s14  ;;  %s18_s16 = int_to_ptr.vmem [resolvable:$true] %s17_s16 }
   0x2   :  { %s965_s18 = smov 8  }
   0x3   :  { %23 = dma.hbm_to_vmem [thread:$0]  %s16_s14, 8192, %s18_s16, [#allocation4], %s964_s17, %s964_s17, %s965_s18  }
   0x4   :  { %961 = dma.done.wait [#allocation4], 8192  }
   0x5   :  { %962 = vsyncadd [#allocation4], 4294959104  ;;  %v966_v0 = vmov 0.0   ;;  %v174_v1 = vld [vmem:[#allocation3 + $0x78] sm:$0xff]  ;;  %v173_v2 = vld [vmem:[#allocation3 + $0x70] sm:$0xff]  ;;  %vm94_vm0 = vcmask 261120  }
   0x6   :  { %30 = vst [vmem:[#allocation2] sm:$0xff] %v966_v0  ;;  %179 = vmatpush.msra.mxu0 %v174_v1  ;;  %v172_v3 = vld [vmem:[#allocation3 + $0x68] sm:$0xff]  ;;  %v171_v4 = vld [vmem:[#allocation3 + $0x60] sm:$0xff]  ;;  %v170_v6 = vld [vmem:[#allocation3 + $0x58] sm:$0xff] }
   0x7   :  { %31 = vst [vmem:[#allocation2 + $0x8] sm:$0xff] %v966_v0  ;;  %v62_v5 = vld [vmem:[%s1426_s0] sm:$0xff]  ;;  %v169_v7 = vld [vmem:[#allocation3 + $0x50] sm:$0xff]  ;;  %v168_v8 = vld [vmem:[#allocation3 + $0x48] sm:$0xff] }
   0x8   :  { %32 = vst [vmem:[#allocation2 + $0x10] sm:$0xff] %v966_v0  ;;  %180 = vmatpush.msra.mxu0 %v173_v2  ;;  %v167_v9 = vld [vmem:[#allocation3 + $0x40] sm:$0xff]  ;;  %v166_v10 = vld [vmem:[#allocation3 + $0x38] sm:$0xff]  ;;  %v165_v11 = vld [vmem:[#allocation3 + $0x30] sm:$0xff] }
   0x9   :  { %33 = vst [vmem:[#allocation2 + $0x18] sm:$0xff] %v966_v0  ;;  %v164_v12 = vld [vmem:[#allocation3 + $0x28] sm:$0xff]  ;;  %v163_v13 = vld [vmem:[#allocation3 + $0x20] sm:$0xff]  ;;  %v162_v14 = vld [vmem:[#allocation3 + $0x18] sm:$0xff] }
   0xa   :  { %34 = vst [vmem:[#allocation2 + $0x20] sm:$0xff] %v966_v0  ;;  %181 = vmatpush.msra.mxu0 %v172_v3  ;;  %v161_v15 = vld [vmem:[#allocation3 + $0x10] sm:$0xff]  ;;  %v63_v16 = vld [vmem:[%s1426_s0 + $0x8] sm:$0xff]  ;;  %v65_v19 = vld [vmem:[%s1426_s0 + $0x18] sm:$0xff] }
   0xb   :  { %35 = vst [vmem:[#allocation2 + $0x28] sm:$0xff] %v966_v0  ;;  %v64_v17 = vld [vmem:[%s1426_s0 + $0x10] sm:$0xff]  ;;  %v160_v18 = vld [vmem:[#allocation3 + $0x8] sm:$0xff]  ;;  %v66_v20 = vld [vmem:[%s1426_s0 + $0x20] sm:$0xff] }
   0xc   :  { %36 = vst [vmem:[#allocation2 + $0x30] sm:$0xff] %v966_v0  ;;  %182 = vmatpush.msra.mxu0 %v171_v4  ;;  %v159_v21 = vld [vmem:[#allocation3] sm:$0xff]  ;;  %v67_v23 = vld [vmem:[%s1426_s0 + $0x28] sm:$0xff]  ;;  %v68_v25 = vld [vmem:[%s1426_s0 + $0x30] sm:$0xff] }
   0xd   :  { %37 = vst [vmem:[#allocation2 + $0x38] sm:$0xff] %v966_v0  ;;  %v69_v27 = vld [vmem:[%s1426_s0 + $0x38] sm:$0xff]  ;;  %v70_v29 = vld [vmem:[%s1426_s0 + $0x40] sm:$0xff]  ;;  %v71_v31 = vld [vmem:[%s1426_s0 + $0x48] sm:$0xff] }
   0xe   :  { %38 = vst [vmem:[#allocation2 + $0x40] sm:$0xff] %v966_v0  ;;  %183 = vmatpush.msra.mxu0 %v170_v6  ;;  %v72_v33 = vld [vmem:[%s1426_s0 + $0x50] sm:$0xff]  ;;  %v73_v35 = vld [vmem:[%s1426_s0 + $0x58] sm:$0xff]  ;;  %v74_v37 = vld [vmem:[%s1426_s0 + $0x60] sm:$0xff] }
   0xf   :  { %39 = vst [vmem:[#allocation2 + $0x48] sm:$0xff] %v966_v0  ;;  %v75_v39 = vld [vmem:[%s1426_s0 + $0x68] sm:$0xff]  ;;  %v372_v40 = vld [vmem:[#allocation3 + $0xf8] sm:$0xff]  ;;  %v371_v41 = vld [vmem:[#allocation3 + $0xf0] sm:$0xff] }
  0x10   :  { %40 = vst [vmem:[#allocation2 + $0x50] sm:$0xff] %v966_v0  ;;  %184 = vmatpush.msra.mxu0 %v169_v7  ;;  %378 = vmatpush.msra.mxu1 %v372_v40  ;;  %v76_v43 = vld [vmem:[%s1426_s0 + $0x70] sm:$0xff]  ;;  %v370_v44 = vld [vmem:[#allocation3 + $0xe8] sm:$0xff]  ;;  %v369_v45 = vld [vmem:[#allocation3 + $0xe0] sm:$0xff] }
  0x11   :  { %41 = vst [vmem:[#allocation2 + $0x58] sm:$0xff] %v966_v0  ;;  %v368_v46 = vld [vmem:[#allocation3 + $0xd8] sm:$0xff]  ;;  %v367_v47 = vld [vmem:[#allocation3 + $0xd0] sm:$0xff]  ;;  %v366_v50 = vld [vmem:[#allocation3 + $0xc8] sm:$0xff] }
  0x12   :  { %95 = vst.msk [vmem:[#allocation2] sm:$0xff] %vm94_vm0, %v62_v5  ;;  %185 = vmatpush.msra.mxu0 %v168_v8  ;;  %379 = vmatpush.msra.mxu1 %v371_v41  ;;  %v77_v49 = vld [vmem:[%s1426_s0 + $0x78] sm:$0xff]  ;;  %v365_v51 = vld [vmem:[#allocation3 + $0xc0] sm:$0xff]  ;;  %v363_v53 = vld [vmem:[#allocation3 + $0xb0] sm:$0xff] }
  0x13   :  { %42 = vst [vmem:[#allocation2 + $0x60] sm:$0xff] %v966_v0  ;;  %v364_v52 = vld [vmem:[#allocation3 + $0xb8] sm:$0xff]  ;;  %v78_v55 = vld [vmem:[%s1426_s0 + $0x80] sm:$0xff]  ;;  %v362_v56 = vld [vmem:[#allocation3 + $0xa8] sm:$0xff] }
  0x14   :  { %43 = vst [vmem:[#allocation2 + $0x68] sm:$0xff] %v966_v0  ;;  %186 = vmatpush.msra.mxu0 %v167_v9  ;;  %380 = vmatpush.msra.mxu1 %v370_v44  ;;  %v361_v57 = vld [vmem:[#allocation3 + $0xa0] sm:$0xff]  ;;  %v360_v58 = vld [vmem:[#allocation3 + $0x98] sm:$0xff]  ;;  %v359_v60 = vld [vmem:[#allocation3 + $0x90] sm:$0xff] }
  0x15   :  { %44 = vst [vmem:[#allocation2 + $0x70] sm:$0xff] %v966_v0  ;;  %v79_v61 = vld [vmem:[%s1426_s0 + $0x88] sm:$0xff]  ;;  %v357_v63 = vld [vmem:[#allocation3 + $0x80] sm:$0xff]  ;;  %v80_v1 = vld [vmem:[%s1426_s0 + $0x90] sm:$0xff] }
  0x16   :  { %45 = vst [vmem:[#allocation2 + $0x78] sm:$0xff] %v966_v0  ;;  %187 = vmatpush.msra.mxu0 %v166_v10  ;;  %381 = vmatpush.msra.mxu1 %v369_v45  ;;  %v358_v62 = vld [vmem:[#allocation3 + $0x88] sm:$0xff]  ;;  %v81_v3 = vld [vmem:[%s1426_s0 + $0x98] sm:$0xff]  ;;  %v82_v5 = vld [vmem:[%s1426_s0 + $0xa0] sm:$0xff] }
  0x17   :  { %46 = vst [vmem:[#allocation2 + $0x80] sm:$0xff] %v966_v0  ;;  %v1109_v6 = vld [vmem:[%s1428_s2] ss:$0 sm:$0xff]  ;;  %v83_v10 = vld [vmem:[%s1426_s0 + $0xa8] sm:$0xff]  ;;  %v88_v40 = vld [vmem:[%s1426_s0 + $0xd0] sm:$0xff] }
  0x18   :  { %47 = vst [vmem:[#allocation2 + $0x88] sm:$0xff] %v966_v0  ;;  %188 = vmatpush.msra.mxu0 %v165_v11  ;;  %382 = vmatpush.msra.mxu1 %v368_v46  ;;  %v89_v46 = vld [vmem:[%s1426_s0 + $0xd8] sm:$0xff] }
  0x19   :  { %48 = vst [vmem:[#allocation2 + $0x90] sm:$0xff] %v966_v0  ;;  %v127_v22 = vld [vmem:[#allocation2] sm:$0xff] }
  0x1a   :  { %49 = vst [vmem:[#allocation2 + $0x98] sm:$0xff] %v966_v0  ;;  %189 = vmatpush.msra.mxu0 %v164_v12  ;;  %383 = vmatpush.msra.mxu1 %v367_v47 }
  0x1b   :  { %50 = vst [vmem:[#allocation2 + $0xa0] sm:$0xff] %v966_v0 }
  0x1c   :  { %51 = vst [vmem:[#allocation2 + $0xa8] sm:$0xff] %v966_v0  ;;  %190 = vmatpush.msra.mxu0 %v163_v13  ;;  %384 = vmatpush.msra.mxu1 %v366_v50 }
  0x1d   :  { %52 = vst [vmem:[#allocation2 + $0xb0] sm:$0xff] %v966_v0 }
  0x1e   :  { %53 = vst [vmem:[#allocation2 + $0xb8] sm:$0xff] %v966_v0  ;;  %191 = vmatpush.msra.mxu0 %v162_v14  ;;  %385 = vmatpush.msra.mxu1 %v365_v51 }
  0x1f   :  { %54 = vst [vmem:[#allocation2 + $0xc0] sm:$0xff] %v966_v0 }
  0x20   :  { %55 = vst [vmem:[#allocation2 + $0xc8] sm:$0xff] %v966_v0  ;;  %192 = vmatpush.msra.mxu0 %v161_v15  ;;  %386 = vmatpush.msra.mxu1 %v364_v52  ;;  %v90_v52 = vld [vmem:[%s1426_s0 + $0xe0] sm:$0xff] }
  0x21   :  { %56 = vst [vmem:[#allocation2 + $0xd0] sm:$0xff] %v966_v0 }
  0x22   :  { %57 = vst [vmem:[#allocation2 + $0xd8] sm:$0xff] %v966_v0  ;;  %193 = vmatpush.msra.mxu0 %v160_v18  ;;  %387 = vmatpush.msra.mxu1 %v363_v53 }
  0x23   :  { %58 = vst [vmem:[#allocation2 + $0xe0] sm:$0xff] %v966_v0 }
  0x24   :  { %59 = vst [vmem:[#allocation2 + $0xe8] sm:$0xff] %v966_v0  ;;  %194 = vmatpush.msra.mxu0 %v159_v21  ;;  %388 = vmatpush.msra.mxu1 %v362_v56 }
  0x25   :  { %60 = vst [vmem:[#allocation2 + $0xf0] sm:$0xff] %v966_v0  ;;  %195 = vmatmul.f32.vlgmr.msra.gmra.mxu0 %v127_v22  ;;  %v85_v22 = vld [vmem:[%s1426_s0 + $0xb8] sm:$0xff] }
  0x26   :  { %61 = vst [vmem:[#allocation2 + $0xf8] sm:$0xff] %v966_v0  ;;  %389 = vmatpush.msra.mxu1 %v361_v57 }
  0x27   :  { %96 = vst.msk [vmem:[#allocation2 + $0x8] sm:$0xff] %vm94_vm0, %v63_v16  ;;  %v84_v16 = vld [vmem:[%s1426_s0 + $0xb0] sm:$0xff] }
  0x28   :  { %97 = vst.msk [vmem:[#allocation2 + $0x10] sm:$0xff] %vm94_vm0, %v64_v17  ;;  %390 = vmatpush.msra.mxu1 %v360_v58  ;;  %v91_v58 = vld [vmem:[%s1426_s0 + $0xe8] sm:$0xff] }
  0x29   :  { %98 = vst.msk [vmem:[#allocation2 + $0x18] sm:$0xff] %vm94_vm0, %v65_v19 }
  0x2a   :  { %99 = vst.msk [vmem:[#allocation2 + $0x20] sm:$0xff] %vm94_vm0, %v66_v20  ;;  %391 = vmatpush.msra.mxu1 %v359_v60 }
  0x2b   :  { %100 = vst.msk [vmem:[#allocation2 + $0x28] sm:$0xff] %vm94_vm0, %v67_v23 }
  0x2c   :  { %101 = vst.msk [vmem:[#allocation2 + $0x30] sm:$0xff] %vm94_vm0, %v68_v25  ;;  %392 = vmatpush.msra.mxu1 %v358_v62 }
  0x2d   :  { %102 = vst.msk [vmem:[#allocation2 + $0x38] sm:$0xff] %vm94_vm0, %v69_v27 }
  0x2e   :  { %v128_v24 = vld [vmem:[#allocation2 + $0x8] sm:$0xff]  ;;  %103 = vst.msk [vmem:[#allocation2 + $0x40] sm:$0xff] %vm94_vm0, %v70_v29  ;;  %393 = vmatpush.msra.mxu1 %v357_v63 }
  0x2f   :  { %198 = vmatmul.f32.gmra.mxu0 %v128_v24  ;;  %v129_v26 = vld [vmem:[#allocation2 + $0x10] sm:$0xff]  ;;  %104 = vst.msk [vmem:[#allocation2 + $0x48] sm:$0xff] %vm94_vm0, %v71_v31 }
  0x30   :  { %v130_v28 = vld [vmem:[#allocation2 + $0x18] sm:$0xff]  ;;  %105 = vst.msk [vmem:[#allocation2 + $0x50] sm:$0xff] %vm94_vm0, %v72_v33 }
  0x31   :  { %v131_v30 = vld [vmem:[#allocation2 + $0x20] sm:$0xff]  ;;  %106 = vst.msk [vmem:[#allocation2 + $0x58] sm:$0xff] %vm94_vm0, %v73_v35 }
  0x32   :  { %v132_v32 = vld [vmem:[#allocation2 + $0x28] sm:$0xff]  ;;  %107 = vst.msk [vmem:[#allocation2 + $0x60] sm:$0xff] %vm94_vm0, %v74_v37 }
  0x33   :  { %v133_v34 = vld [vmem:[#allocation2 + $0x30] sm:$0xff]  ;;  %108 = vst.msk [vmem:[#allocation2 + $0x68] sm:$0xff] %vm94_vm0, %v75_v39 }
  0x34   :  { %v134_v36 = vld [vmem:[#allocation2 + $0x38] sm:$0xff]  ;;  %109 = vst.msk [vmem:[#allocation2 + $0x70] sm:$0xff] %vm94_vm0, %v76_v43 }
  0x35   :  { %v135_v38 = vld [vmem:[#allocation2 + $0x40] sm:$0xff]  ;;  %110 = vst.msk [vmem:[#allocation2 + $0x78] sm:$0xff] %vm94_vm0, %v77_v49 }
  0x36   :  { %v136_v42 = vld [vmem:[#allocation2 + $0x48] sm:$0xff]  ;;  %111 = vst.msk [vmem:[#allocation2 + $0x80] sm:$0xff] %vm94_vm0, %v78_v55 }
  0x37   :  { %201 = vmatmul.f32.gmra.mxu0 %v129_v26  ;;  %v137_v48 = vld [vmem:[#allocation2 + $0x50] sm:$0xff]  ;;  %112 = vst.msk [vmem:[#allocation2 + $0x88] sm:$0xff] %vm94_vm0, %v79_v61 }
  0x38   :  { %v138_v54 = vld [vmem:[#allocation2 + $0x58] sm:$0xff]  ;;  %113 = vst.msk [vmem:[#allocation2 + $0x90] sm:$0xff] %vm94_vm0, %v80_v1 }
  0x39   :  { %v139_v59 = vld [vmem:[#allocation2 + $0x60] sm:$0xff]  ;;  %114 = vst.msk [vmem:[#allocation2 + $0x98] sm:$0xff] %vm94_vm0, %v81_v3  ;;  %v570_v3 = vld [vmem:[#allocation3 + $0x170] sm:$0xff] }
  0x3a   :  { %v140_v0 = vld [vmem:[#allocation2 + $0x68] sm:$0xff]  ;;  %115 = vst.msk [vmem:[#allocation2 + $0xa0] sm:$0xff] %vm94_vm0, %v82_v5 }
  0x3b   :  { %v141_v2 = vld [vmem:[#allocation2 + $0x70] sm:$0xff]  ;;  %116 = vst.msk [vmem:[#allocation2 + $0xa8] sm:$0xff] %vm94_vm0, %v83_v10  ;;  %v569_v5 = vld [vmem:[#allocation3 + $0x168] sm:$0xff]  ;;  %v568_v10 = vld [vmem:[#allocation3 + $0x160] sm:$0xff] }
  0x3c   :  { %v142_v4 = vld [vmem:[#allocation2 + $0x78] sm:$0xff]  ;;  %117 = vst.msk [vmem:[#allocation2 + $0xb0] sm:$0xff] %vm94_vm0, %v84_v16  ;;  %v565_v16 = vld [vmem:[#allocation3 + $0x148] sm:$0xff] }
  0x3d   :  { %v143_v8 = vld [vmem:[#allocation2 + $0x80] sm:$0xff]  ;;  %118 = vst.msk [vmem:[#allocation2 + $0xb8] sm:$0xff] %vm94_vm0, %v85_v22  ;;  %v563_v22 = vld [vmem:[#allocation3 + $0x138] sm:$0xff] }
  0x3e   :  { %v144_v14 = vld [vmem:[#allocation2 + $0x88] sm:$0xff]  ;;  %121 = vst.msk [vmem:[#allocation2 + $0xd0] sm:$0xff] %vm94_vm0, %v88_v40 }
  0x3f   :  { %204 = vmatmul.f32.gmra.mxu0 %v130_v28  ;;  %v145_v20 = vld [vmem:[#allocation2 + $0x90] sm:$0xff]  ;;  %v86_v28 = vld [vmem:[%s1426_s0 + $0xc0] sm:$0xff]  ;;  %122 = vst.msk [vmem:[#allocation2 + $0xd8] sm:$0xff] %vm94_vm0, %v89_v46 }
  0x40   :  { %v146_v26 = vld [vmem:[#allocation2 + $0x98] sm:$0xff]  ;;  %119 = vst.msk [vmem:[#allocation2 + $0xc0] sm:$0xff] %vm94_vm0, %v86_v28 }
  0x41   :  { %123 = vst.msk [vmem:[#allocation2 + $0xe0] sm:$0xff] %vm94_vm0, %v90_v52 }
  0x42   :  { %124 = vst.msk [vmem:[#allocation2 + $0xe8] sm:$0xff] %vm94_vm0, %v91_v58 }
  0x43   :  { %v149_v44 = vld [vmem:[#allocation2 + $0xb0] sm:$0xff] }
  0x44   :  { %v150_v50 = vld [vmem:[#allocation2 + $0xb8] sm:$0xff] }
  0x47   :  { %207 = vmatmul.f32.gmra.mxu0 %v131_v30  ;;  %v151_v56 = vld [vmem:[#allocation2 + $0xc0] sm:$0xff] }
  0x4f   :  { %210 = vmatmul.f32.gmra.mxu0 %v132_v32  ;;  %v147_v32 = vld [vmem:[#allocation2 + $0xa0] sm:$0xff] }
  0x57   :  { %213 = vmatmul.f32.gmra.mxu0 %v133_v34  ;;  %v87_v34 = vld [vmem:[%s1426_s0 + $0xc8] sm:$0xff] }
  0x58   :  { %120 = vst.msk [vmem:[#allocation2 + $0xc8] sm:$0xff] %vm94_vm0, %v87_v34  ;;  %v557_v34 = vld [vmem:[#allocation3 + $0x108] sm:$0xff] }
  0x5f   :  { %216 = vmatmul.f32.gmra.mxu0 %v134_v36  ;;  %v152_v62 = vld [vmem:[#allocation2 + $0xc8] sm:$0xff] }
  0x67   :  { %219 = vmatmul.f32.gmra.mxu0 %v135_v38  ;;  %v148_v38 = vld [vmem:[#allocation2 + $0xa8] sm:$0xff] }
  0x6f   :  { %222 = vmatmul.f32.gmra.mxu0 %v136_v42 }
  0x77   :  { %225 = vmatmul.f32.gmra.mxu0 %v137_v48 }
  0x7f   :  { %228 = vmatmul.f32.gmra.mxu0 %v138_v54 }
  0x87   :  { %231 = vmatmul.f32.gmra.mxu0 %v139_v59 }
  0x8f   :  { %234 = vmatmul.f32.gmra.mxu0 %v140_v0  ;;  %v92_v0 = vld [vmem:[%s1426_s0 + $0xf0] sm:$0xff] }
  0x90   :  { %125 = vst.msk [vmem:[#allocation2 + $0xf0] sm:$0xff] %vm94_vm0, %v92_v0 }
  0x97   :  { %237 = vmatmul.f32.gmra.mxu0 %v141_v2  ;;  %v571_v2 = vld [vmem:[#allocation3 + $0x178] sm:$0xff] }
  0x98   :  { %577 = vmatpush.msra.mxu2 %v571_v2 }
  0x9a   :  { %578 = vmatpush.msra.mxu2 %v570_v3 }
  0x9c   :  { %579 = vmatpush.msra.mxu2 %v569_v5 }
  0x9e   :  { %580 = vmatpush.msra.mxu2 %v568_v10 }
  0x9f   :  { %240 = vmatmul.f32.gmra.mxu0 %v142_v4 }
  0xa2   :  { %v196_v7 = vpop.f32.mrf.mxu0 }
  0xa3   :  { %v197_v9 = vadd.f32 %v1109_v6, %v196_v7 }
  0xa5   :  { %v292_v11 = vmul.f32 0.01, %v197_v9 }
  0xa7   :  { %243 = vmatmul.f32.gmra.mxu0 %v143_v8  ;;  %v324_v12 = vmax.f32 %v197_v9, %v292_v11  ;;  %v153_v8 = vld [vmem:[#allocation2 + $0xd0] sm:$0xff]  ;;  %v93_v11 = vld [vmem:[%s1426_s0 + $0xf8] sm:$0xff] }
  0xa8   :  { %126 = vst.msk [vmem:[#allocation2 + $0xf8] sm:$0xff] %vm94_vm0, %v93_v11 }
  0xa9   :  { %394 = vmatmul.f32.vlgmr.msra.gmra.mxu1 %v324_v12 }
  0xac   :  { %v199_v13 = vpop.f32.mrf.mxu0 }
  0xad   :  { %v200_v15 = vadd.f32 %v1109_v6, %v199_v13  ;;  %v567_v13 = vld [vmem:[#allocation3 + $0x158] sm:$0xff] }
  0xae   :  { %581 = vmatpush.msra.mxu2 %v567_v13 }
  0xaf   :  { %246 = vmatmul.f32.gmra.mxu0 %v144_v14  ;;  %v293_v17 = vmul.f32 0.01, %v200_v15  ;;  %v566_v14 = vld [vmem:[#allocation3 + $0x150] sm:$0xff] }
  0xb0   :  { %582 = vmatpush.msra.mxu2 %v566_v14 }
  0xb1   :  { %v325_v18 = vmax.f32 %v200_v15, %v293_v17 }
  0xb2   :  { %583 = vmatpush.msra.mxu2 %v565_v16 }
  0xb3   :  { %397 = vmatmul.f32.gmra.mxu1 %v325_v18  ;;  %v154_v18 = vld [vmem:[#allocation2 + $0xd8] sm:$0xff] }
  0xb4   :  { %v202_v19 = vpop.f32.mrf.mxu0 }
  0xb5   :  { %v203_v21 = vadd.f32 %v1109_v6, %v202_v19 }
  0xb7   :  { %249 = vmatmul.f32.gmra.mxu0 %v145_v20  ;;  %v294_v23 = vmul.f32 0.01, %v203_v21  ;;  %v564_v20 = vld [vmem:[#allocation3 + $0x140] sm:$0xff] }
  0xb8   :  { %584 = vmatpush.msra.mxu2 %v564_v20 }
  0xb9   :  { %v326_v24 = vmax.f32 %v203_v21, %v294_v23  ;;  %v562_v23 = vld [vmem:[#allocation3 + $0x130] sm:$0xff] }
  0xba   :  { %585 = vmatpush.msra.mxu2 %v563_v22 }
  0xbb   :  { %400 = vmatmul.f32.gmra.mxu1 %v326_v24 }
  0xbc   :  { %v205_v25 = vpop.f32.mrf.mxu0  ;;  %586 = vmatpush.msra.mxu2 %v562_v23 }
  0xbd   :  { %v206_v27 = vadd.f32 %v1109_v6, %v205_v25  ;;  %v561_v25 = vld [vmem:[#allocation3 + $0x128] sm:$0xff] }
  0xbe   :  { %587 = vmatpush.msra.mxu2 %v561_v25 }
  0xbf   :  { %252 = vmatmul.f32.gmra.mxu0 %v146_v26  ;;  %v295_v29 = vmul.f32 0.01, %v206_v27 }
  0xc1   :  { %v327_v30 = vmax.f32 %v206_v27, %v295_v29  ;;  %v155_v27 = vld [vmem:[#allocation2 + $0xe0] sm:$0xff] }
  0xc2   :  { %v560_v29 = vld [vmem:[#allocation3 + $0x120] sm:$0xff] }
  0xc3   :  { %403 = vmatmul.f32.gmra.mxu1 %v327_v30  ;;  %588 = vmatpush.msra.mxu2 %v560_v29 }
  0xc4   :  { %v208_v31 = vpop.f32.mrf.mxu0 }
  0xc5   :  { %v209_v33 = vadd.f32 %v1109_v6, %v208_v31  ;;  %v559_v31 = vld [vmem:[#allocation3 + $0x118] sm:$0xff] }
  0xc6   :  { %589 = vmatpush.msra.mxu2 %v559_v31 }
  0xc7   :  { %255 = vmatmul.f32.gmra.mxu0 %v147_v32  ;;  %v296_v35 = vmul.f32 0.01, %v209_v33 }
  0xc9   :  { %v328_v36 = vmax.f32 %v209_v33, %v296_v35  ;;  %v558_v33 = vld [vmem:[#allocation3 + $0x110] sm:$0xff] }
  0xca   :  { %590 = vmatpush.msra.mxu2 %v558_v33 }
  0xcb   :  { %406 = vmatmul.f32.gmra.mxu1 %v328_v36  ;;  %v156_v36 = vld [vmem:[#allocation2 + $0xe8] sm:$0xff] }
  0xcc   :  { %v211_v37 = vpop.f32.mrf.mxu0  ;;  %591 = vmatpush.msra.mxu2 %v557_v34 }
  0xcd   :  { %v212_v39 = vadd.f32 %v1109_v6, %v211_v37 }
  0xcf   :  { %258 = vmatmul.f32.gmra.mxu0 %v148_v38  ;;  %v297_v41 = vmul.f32 0.01, %v212_v39  ;;  %v556_v38 = vld [vmem:[#allocation3 + $0x100] sm:$0xff] }
  0xd0   :  { %592 = vmatpush.msra.mxu2 %v556_v38 }
  0xd1   :  { %v329_v42 = vmax.f32 %v212_v39, %v297_v41 }
  0xd3   :  { %409 = vmatmul.f32.gmra.mxu1 %v329_v42  ;;  %v157_v42 = vld [vmem:[#allocation2 + $0xf0] sm:$0xff] }
  0xd4   :  { %v214_v43 = vpop.f32.mrf.mxu0 }
  0xd5   :  { %v215_v45 = vadd.f32 %v1109_v6, %v214_v43 }
  0xd7   :  { %261 = vmatmul.f32.gmra.mxu0 %v149_v44  ;;  %v298_v47 = vmul.f32 0.01, %v215_v45 }
  0xd9   :  { %v330_v48 = vmax.f32 %v215_v45, %v298_v47  ;;  %v158_v47 = vld [vmem:[#allocation2 + $0xf8] sm:$0xff] }
  0xdb   :  { %412 = vmatmul.f32.gmra.mxu1 %v330_v48 }
  0xdc   :  { %v217_v49 = vpop.f32.mrf.mxu0 }
  0xdd   :  { %v218_v51 = vadd.f32 %v1109_v6, %v217_v49 }
  0xdf   :  { %264 = vmatmul.f32.gmra.mxu0 %v150_v50  ;;  %v299_v53 = vmul.f32 0.01, %v218_v51 }
  0xe1   :  { %v331_v54 = vmax.f32 %v218_v51, %v299_v53  ;;  %v1175_v53 = vld [vmem:[%s1428_s2 + $0x1] ss:$0 sm:$0xff] }
  0xe3   :  { %415 = vmatmul.f32.gmra.mxu1 %v331_v54 }
  0xe4   :  { %v220_v55 = vpop.f32.mrf.mxu0 }
  0xe5   :  { %v221_v57 = vadd.f32 %v1109_v6, %v220_v55 }
  0xe7   :  { %v300_v59 = vmul.f32 0.01, %v221_v57  ;;  %267 = vmatmul.f32.gmra.mxu0 %v151_v56 }
  0xe9   :  { %v332_v60 = vmax.f32 %v221_v57, %v300_v59 }
  0xeb   :  { %418 = vmatmul.f32.gmra.mxu1 %v332_v60 }
  0xec   :  { %v223_v61 = vpop.f32.mrf.mxu0 }
  0xed   :  { %v224_v63 = vadd.f32 %v1109_v6, %v223_v61 }
  0xef   :  { %v301_v1 = vmul.f32 0.01, %v224_v63  ;;  %270 = vmatmul.f32.gmra.mxu0 %v152_v62 }
  0xf1   :  { %v333_v4 = vmax.f32 %v224_v63, %v301_v1 }
  0xf3   :  { %421 = vmatmul.f32.gmra.mxu1 %v333_v4 }
  0xf4   :  { %v226_v7 = vpop.f32.mrf.mxu0 }
  0xf5   :  { %v227_v9 = vadd.f32 %v1109_v6, %v226_v7 }
  0xf7   :  { %v302_v12 = vmul.f32 0.01, %v227_v9  ;;  %273 = vmatmul.f32.gmra.mxu0 %v153_v8 }
  0xf9   :  { %v334_v15 = vmax.f32 %v227_v9, %v302_v12 }
  0xfb   :  { %424 = vmatmul.f32.gmra.mxu1 %v334_v15 }
  0xfc   :  { %v229_v17 = vpop.f32.mrf.mxu0 }
  0xfd   :  { %v230_v19 = vadd.f32 %v1109_v6, %v229_v17 }
  0xff   :  { %v303_v21 = vmul.f32 0.01, %v230_v19  ;;  %276 = vmatmul.f32.gmra.mxu0 %v154_v18 }
 0x101   :  { %v335_v24 = vmax.f32 %v230_v19, %v303_v21 }
 0x103   :  { %427 = vmatmul.f32.gmra.mxu1 %v335_v24 }
 0x104   :  { %v232_v26 = vpop.f32.mrf.mxu0 }
 0x105   :  { %v233_v28 = vadd.f32 %v1109_v6, %v232_v26 }
 0x107   :  { %v304_v30 = vmul.f32 0.01, %v233_v28  ;;  %279 = vmatmul.f32.gmra.mxu0 %v155_v27 }
 0x109   :  { %v336_v32 = vmax.f32 %v233_v28, %v304_v30 }
 0x10b   :  { %430 = vmatmul.f32.gmra.mxu1 %v336_v32 }
 0x10c   :  { %v235_v35 = vpop.f32.mrf.mxu0 }
 0x10d   :  { %v236_v37 = vadd.f32 %v1109_v6, %v235_v35 }
 0x10f   :  { %v305_v39 = vmul.f32 0.01, %v236_v37  ;;  %282 = vmatmul.f32.gmra.mxu0 %v156_v36 }
 0x111   :  { %v337_v40 = vmax.f32 %v236_v37, %v305_v39 }
 0x113   :  { %433 = vmatmul.f32.gmra.mxu1 %v337_v40 }
 0x114   :  { %v238_v41 = vpop.f32.mrf.mxu0 }
 0x115   :  { %v239_v43 = vadd.f32 %v1109_v6, %v238_v41 }
 0x117   :  { %v306_v44 = vmul.f32 0.01, %v239_v43  ;;  %285 = vmatmul.f32.gmra.mxu0 %v157_v42 }
 0x119   :  { %v338_v45 = vmax.f32 %v239_v43, %v306_v44 }
 0x11b   :  { %436 = vmatmul.f32.gmra.mxu1 %v338_v45 }
 0x11c   :  { %v241_v46 = vpop.f32.mrf.mxu0 }
 0x11d   :  { %v242_v48 = vadd.f32 %v1109_v6, %v241_v46 }
 0x11f   :  { %v307_v49 = vmul.f32 0.01, %v242_v48  ;;  %288 = vmatmul.f32.gmra.mxu0 %v158_v47 }
 0x121   :  { %v339_v50 = vmax.f32 %v242_v48, %v307_v49 }
 0x123   :  { %439 = vmatmul.f32.gmra.mxu1 %v339_v50 }
 0x124   :  { %v244_v51 = vpop.f32.mrf.mxu0 }
 0x125   :  { %v245_v52 = vadd.f32 %v1109_v6, %v244_v51 }
 0x126   :  { %v395_v55 = vpop.f32.mrf.mxu1 }
 0x127   :  { %v308_v54 = vmul.f32 0.01, %v245_v52  ;;  %v396_v56 = vadd.f32 %v1175_v53, %v395_v55 }
 0x129   :  { %v340_v57 = vmax.f32 %v245_v52, %v308_v54  ;;  %v491_v58 = vmul.f32 0.01, %v396_v56 }
 0x12b   :  { %442 = vmatmul.f32.gmra.mxu1 %v340_v57  ;;  %v523_v61 = vmax.f32 %v396_v56, %v491_v58 }
 0x12c   :  { %v247_v59 = vpop.f32.mrf.mxu0 }
 0x12d   :  { %v248_v60 = vadd.f32 %v1109_v6, %v247_v59  ;;  %593 = vmatmul.f32.vlgmr.msra.gmra.mxu2 %v523_v61 }
 0x12f   :  { %v309_v62 = vmul.f32 0.01, %v248_v60 }
 0x130   :  { %v398_v63 = vpop.f32.mrf.mxu1 }
 0x131   :  { %v399_v0 = vadd.f32 %v1175_v53, %v398_v63  ;;  %v341_v1 = vmax.f32 %v248_v60, %v309_v62 }
 0x133   :  { %445 = vmatmul.f32.gmra.mxu1 %v341_v1  ;;  %v492_v2 = vmul.f32 0.01, %v399_v0 }
 0x134   :  { %v250_v3 = vpop.f32.mrf.mxu0 }
 0x135   :  { %v251_v4 = vadd.f32 %v1109_v6, %v250_v3  ;;  %v524_v5 = vmax.f32 %v399_v0, %v492_v2 }
 0x137   :  { %v310_v7 = vmul.f32 0.01, %v251_v4  ;;  %596 = vmatmul.f32.gmra.mxu2 %v524_v5 }
 0x138   :  { %v401_v8 = vpop.f32.mrf.mxu1 }
 0x139   :  { %v402_v9 = vadd.f32 %v1175_v53, %v401_v8  ;;  %v342_v10 = vmax.f32 %v251_v4, %v310_v7 }
 0x13b   :  { %448 = vmatmul.f32.gmra.mxu1 %v342_v10  ;;  %v493_v11 = vmul.f32 0.01, %v402_v9 }
 0x13c   :  { %v253_v12 = vpop.f32.mrf.mxu0 }
 0x13d   :  { %v254_v13 = vadd.f32 %v1109_v6, %v253_v12  ;;  %v525_v14 = vmax.f32 %v402_v9, %v493_v11 }
 0x13f   :  { %v311_v15 = vmul.f32 0.01, %v254_v13  ;;  %599 = vmatmul.f32.gmra.mxu2 %v525_v14 }
 0x140   :  { %v404_v16 = vpop.f32.mrf.mxu1 }
 0x141   :  { %v405_v17 = vadd.f32 %v1175_v53, %v404_v16  ;;  %v343_v18 = vmax.f32 %v254_v13, %v311_v15  ;;  %v770_v13 = vld [vmem:[#allocation3 + $0x1f8] sm:$0xff]  ;;  %v769_v15 = vld [vmem:[#allocation3 + $0x1f0] sm:$0xff] }
 0x142   :  { %776 = vmatpush.msra.mxu3 %v770_v13 }
 0x143   :  { %451 = vmatmul.f32.gmra.mxu1 %v343_v18  ;;  %v494_v19 = vmul.f32 0.01, %v405_v17 }
 0x144   :  { %v256_v20 = vpop.f32.mrf.mxu0  ;;  %777 = vmatpush.msra.mxu3 %v769_v15 }
 0x145   :  { %v257_v21 = vadd.f32 %v1109_v6, %v256_v20  ;;  %v526_v22 = vmax.f32 %v405_v17, %v494_v19  ;;  %v768_v19 = vld [vmem:[#allocation3 + $0x1e8] sm:$0xff] }
 0x146   :  { %778 = vmatpush.msra.mxu3 %v768_v19 }
 0x147   :  { %v312_v23 = vmul.f32 0.01, %v257_v21  ;;  %602 = vmatmul.f32.gmra.mxu2 %v526_v22 }
 0x148   :  { %v407_v24 = vpop.f32.mrf.mxu1 }
 0x149   :  { %v408_v25 = vadd.f32 %v1175_v53, %v407_v24  ;;  %v344_v26 = vmax.f32 %v257_v21, %v312_v23  ;;  %v767_v21 = vld [vmem:[#allocation3 + $0x1e0] sm:$0xff] }
 0x14a   :  { %779 = vmatpush.msra.mxu3 %v767_v21 }
 0x14b   :  { %454 = vmatmul.f32.gmra.mxu1 %v344_v26  ;;  %v495_v27 = vmul.f32 0.01, %v408_v25 }
 0x14c   :  { %v259_v28 = vpop.f32.mrf.mxu0 }
 0x14d   :  { %v260_v29 = vadd.f32 %v1109_v6, %v259_v28  ;;  %v527_v30 = vmax.f32 %v408_v25, %v495_v27  ;;  %v766_v25 = vld [vmem:[#allocation3 + $0x1d8] sm:$0xff]  ;;  %v765_v27 = vld [vmem:[#allocation3 + $0x1d0] sm:$0xff]  ;;  %v764_v28 = vld [vmem:[#allocation3 + $0x1c8] sm:$0xff] }
 0x14e   :  { %780 = vmatpush.msra.mxu3 %v766_v25 }
 0x14f   :  { %v313_v31 = vmul.f32 0.01, %v260_v29  ;;  %605 = vmatmul.f32.gmra.mxu2 %v527_v30 }
 0x150   :  { %v410_v32 = vpop.f32.mrf.mxu1  ;;  %781 = vmatpush.msra.mxu3 %v765_v27 }
 0x151   :  { %v411_v33 = vadd.f32 %v1175_v53, %v410_v32  ;;  %v345_v34 = vmax.f32 %v260_v29, %v313_v31 }
 0x152   :  { %782 = vmatpush.msra.mxu3 %v764_v28 }
 0x153   :  { %457 = vmatmul.f32.gmra.mxu1 %v345_v34  ;;  %v496_v35 = vmul.f32 0.01, %v411_v33 }
 0x154   :  { %v262_v36 = vpop.f32.mrf.mxu0 }
 0x155   :  { %v263_v37 = vadd.f32 %v1109_v6, %v262_v36  ;;  %v528_v38 = vmax.f32 %v411_v33, %v496_v35  ;;  %v763_v33 = vld [vmem:[#allocation3 + $0x1c0] sm:$0xff] }
 0x156   :  { %783 = vmatpush.msra.mxu3 %v763_v33 }
 0x157   :  { %v314_v39 = vmul.f32 0.01, %v263_v37  ;;  %608 = vmatmul.f32.gmra.mxu2 %v528_v38 }
 0x158   :  { %v413_v40 = vpop.f32.mrf.mxu1 }
 0x159   :  { %v414_v41 = vadd.f32 %v1175_v53, %v413_v40  ;;  %v346_v42 = vmax.f32 %v263_v37, %v314_v39  ;;  %v762_v37 = vld [vmem:[#allocation3 + $0x1b8] sm:$0xff]  ;;  %v761_v39 = vld [vmem:[#allocation3 + $0x1b0] sm:$0xff]  ;;  %v760_v40 = vld [vmem:[#allocation3 + $0x1a8] sm:$0xff] }
 0x15a   :  { %784 = vmatpush.msra.mxu3 %v762_v37 }
 0x15b   :  { %460 = vmatmul.f32.gmra.mxu1 %v346_v42  ;;  %v497_v43 = vmul.f32 0.01, %v414_v41 }
 0x15c   :  { %v265_v44 = vpop.f32.mrf.mxu0  ;;  %785 = vmatpush.msra.mxu3 %v761_v39 }
 0x15d   :  { %v266_v45 = vadd.f32 %v1109_v6, %v265_v44  ;;  %v529_v46 = vmax.f32 %v414_v41, %v497_v43 }
 0x15e   :  { %786 = vmatpush.msra.mxu3 %v760_v40 }
 0x15f   :  { %v315_v47 = vmul.f32 0.01, %v266_v45  ;;  %611 = vmatmul.f32.gmra.mxu2 %v529_v46 }
 0x160   :  { %v416_v48 = vpop.f32.mrf.mxu1 }
 0x161   :  { %v417_v49 = vadd.f32 %v1175_v53, %v416_v48  ;;  %v347_v50 = vmax.f32 %v266_v45, %v315_v47  ;;  %v759_v45 = vld [vmem:[#allocation3 + $0x1a0] sm:$0xff] }
 0x162   :  { %787 = vmatpush.msra.mxu3 %v759_v45 }
 0x163   :  { %463 = vmatmul.f32.gmra.mxu1 %v347_v50  ;;  %v498_v51 = vmul.f32 0.01, %v417_v49 }
 0x164   :  { %v268_v52 = vpop.f32.mrf.mxu0 }
 0x165   :  { %v269_v54 = vadd.f32 %v1109_v6, %v268_v52  ;;  %v530_v55 = vmax.f32 %v417_v49, %v498_v51  ;;  %v758_v49 = vld [vmem:[#allocation3 + $0x198] sm:$0xff]  ;;  %v757_v51 = vld [vmem:[#allocation3 + $0x190] sm:$0xff]  ;;  %v756_v52 = vld [vmem:[#allocation3 + $0x188] sm:$0xff] }
 0x166   :  { %788 = vmatpush.msra.mxu3 %v758_v49 }
 0x167   :  { %v316_v56 = vmul.f32 0.01, %v269_v54  ;;  %614 = vmatmul.f32.gmra.mxu2 %v530_v55 }
 0x168   :  { %v419_v57 = vpop.f32.mrf.mxu1  ;;  %789 = vmatpush.msra.mxu3 %v757_v51 }
 0x169   :  { %v348_v58 = vmax.f32 %v269_v54, %v316_v56  ;;  %v420_v59 = vadd.f32 %v1175_v53, %v419_v57 }
 0x16a   :  { %790 = vmatpush.msra.mxu3 %v756_v52 }
 0x16b   :  { %v499_v60 = vmul.f32 0.01, %v420_v59  ;;  %466 = vmatmul.f32.gmra.mxu1 %v348_v58  ;;  %v755_v58 = vld [vmem:[#allocation3 + $0x180] sm:$0xff] }
 0x16c   :  { %v271_v61 = vpop.f32.mrf.mxu0  ;;  %791 = vmatpush.msra.mxu3 %v755_v58 }
 0x16d   :  { %v272_v62 = vadd.f32 %v1109_v6, %v271_v61  ;;  %v531_v63 = vmax.f32 %v420_v59, %v499_v60 }
 0x16f   :  { %v317_v0 = vmul.f32 0.01, %v272_v62  ;;  %617 = vmatmul.f32.gmra.mxu2 %v531_v63 }
 0x170   :  { %v422_v1 = vpop.f32.mrf.mxu1 }
 0x171   :  { %v349_v2 = vmax.f32 %v272_v62, %v317_v0  ;;  %v423_v3 = vadd.f32 %v1175_v53, %v422_v1 }
 0x173   :  { %v500_v4 = vmul.f32 0.01, %v423_v3  ;;  %469 = vmatmul.f32.gmra.mxu1 %v349_v2 }
 0x174   :  { %v274_v5 = vpop.f32.mrf.mxu0 }
 0x175   :  { %v275_v7 = vadd.f32 %v1109_v6, %v274_v5  ;;  %v532_v8 = vmax.f32 %v423_v3, %v500_v4 }
 0x177   :  { %v318_v9 = vmul.f32 0.01, %v275_v7  ;;  %620 = vmatmul.f32.gmra.mxu2 %v532_v8 }
 0x178   :  { %v425_v10 = vpop.f32.mrf.mxu1 }
 0x179   :  { %v350_v11 = vmax.f32 %v275_v7, %v318_v9  ;;  %v426_v12 = vadd.f32 %v1175_v53, %v425_v10 }
 0x17b   :  { %v501_v14 = vmul.f32 0.01, %v426_v12  ;;  %472 = vmatmul.f32.gmra.mxu1 %v350_v11 }
 0x17c   :  { %v277_v16 = vpop.f32.mrf.mxu0 }
 0x17d   :  { %v278_v17 = vadd.f32 %v1109_v6, %v277_v16  ;;  %v533_v18 = vmax.f32 %v426_v12, %v501_v14 }
 0x17f   :  { %v319_v20 = vmul.f32 0.01, %v278_v17  ;;  %623 = vmatmul.f32.gmra.mxu2 %v533_v18 }
 0x180   :  { %v428_v22 = vpop.f32.mrf.mxu1 }
 0x181   :  { %v351_v23 = vmax.f32 %v278_v17, %v319_v20  ;;  %v429_v24 = vadd.f32 %v1175_v53, %v428_v22 }
 0x183   :  { %v502_v26 = vmul.f32 0.01, %v429_v24  ;;  %475 = vmatmul.f32.gmra.mxu1 %v351_v23 }
 0x184   :  { %v280_v29 = vpop.f32.mrf.mxu0 }
 0x185   :  { %v281_v30 = vadd.f32 %v1109_v6, %v280_v29  ;;  %v534_v31 = vmax.f32 %v429_v24, %v502_v26 }
 0x187   :  { %v320_v32 = vmul.f32 0.01, %v281_v30  ;;  %626 = vmatmul.f32.gmra.mxu2 %v534_v31 }
 0x188   :  { %v431_v34 = vpop.f32.mrf.mxu1 }
 0x189   :  { %v352_v35 = vmax.f32 %v281_v30, %v320_v32  ;;  %v432_v36 = vadd.f32 %v1175_v53, %v431_v34 }
 0x18b   :  { %v503_v38 = vmul.f32 0.01, %v432_v36  ;;  %478 = vmatmul.f32.gmra.mxu1 %v352_v35 }
 0x18c   :  { %v283_v41 = vpop.f32.mrf.mxu0 }
 0x18d   :  { %v284_v42 = vadd.f32 %v1109_v6, %v283_v41  ;;  %v535_v43 = vmax.f32 %v432_v36, %v503_v38 }
 0x18f   :  { %v321_v44 = vmul.f32 0.01, %v284_v42  ;;  %629 = vmatmul.f32.gmra.mxu2 %v535_v43 }
 0x190   :  { %v434_v46 = vpop.f32.mrf.mxu1 }
 0x191   :  { %v353_v47 = vmax.f32 %v284_v42, %v321_v44  ;;  %v435_v48 = vadd.f32 %v1175_v53, %v434_v46 }
 0x193   :  { %v504_v50 = vmul.f32 0.01, %v435_v48  ;;  %481 = vmatmul.f32.gmra.mxu1 %v353_v47 }
 0x194   :  { %v286_v54 = vpop.f32.mrf.mxu0 }
 0x195   :  { %v287_v55 = vadd.f32 %v1109_v6, %v286_v54  ;;  %v536_v56 = vmax.f32 %v435_v48, %v504_v50 }
 0x197   :  { %v322_v57 = vmul.f32 0.01, %v287_v55  ;;  %632 = vmatmul.f32.gmra.mxu2 %v536_v56 }
 0x198   :  { %v437_v59 = vpop.f32.mrf.mxu1 }
 0x199   :  { %v354_v60 = vmax.f32 %v287_v55, %v322_v57  ;;  %v438_v61 = vadd.f32 %v1175_v53, %v437_v59 }
 0x19b   :  { %v505_v62 = vmul.f32 0.01, %v438_v61  ;;  %484 = vmatmul.f32.gmra.mxu1 %v354_v60 }
 0x19c   :  { %v289_v63 = vpop.f32.mrf.mxu0 }
 0x19d   :  { %v290_v0 = vadd.f32 %v1109_v6, %v289_v63  ;;  %v537_v1 = vmax.f32 %v438_v61, %v505_v62  ;;  %v1212_v6 = vld [vmem:[%s1428_s2 + $0x2] ss:$0 sm:$0xff] }
 0x19f   :  { %v323_v2 = vmul.f32 0.01, %v290_v0  ;;  %635 = vmatmul.f32.gmra.mxu2 %v537_v1 }
 0x1a0   :  { %v440_v3 = vpop.f32.mrf.mxu1 }
 0x1a1   :  { %v355_v4 = vmax.f32 %v290_v0, %v323_v2  ;;  %v441_v5 = vadd.f32 %v1175_v53, %v440_v3 }
 0x1a3   :  { %v506_v7 = vmul.f32 0.01, %v441_v5  ;;  %487 = vmatmul.f32.gmra.mxu1 %v355_v4 }
 0x1a5   :  { %v538_v8 = vmax.f32 %v441_v5, %v506_v7 }
 0x1a7   :  { %638 = vmatmul.f32.gmra.mxu2 %v538_v8 }
 0x1a8   :  { %v443_v9 = vpop.f32.mrf.mxu1 }
 0x1a9   :  { %v444_v10 = vadd.f32 %v1175_v53, %v443_v9 }
 0x1ab   :  { %v507_v11 = vmul.f32 0.01, %v444_v10 }
 0x1ad   :  { %v539_v12 = vmax.f32 %v444_v10, %v507_v11 }
 0x1af   :  { %641 = vmatmul.f32.gmra.mxu2 %v539_v12 }
 0x1b0   :  { %v446_v13 = vpop.f32.mrf.mxu1  ;;  %v594_v15 = vpop.f32.mrf.mxu2 }
 0x1b1   :  { %v447_v14 = vadd.f32 %v1175_v53, %v446_v13  ;;  %v595_v17 = vadd.f32 %v1212_v6, %v594_v15 }
 0x1b3   :  { %v508_v16 = vmul.f32 0.01, %v447_v14  ;;  %v690_v19 = vmul.f32 0.01, %v595_v17 }
 0x1b5   :  { %v540_v18 = vmax.f32 %v447_v14, %v508_v16  ;;  %v722_v20 = vmax.f32 %v595_v17, %v690_v19 }
 0x1b7   :  { %644 = vmatmul.f32.gmra.mxu2 %v540_v18  ;;  %792 = vmatmul.f32.vlgmr.msra.gmra.mxu3 %v722_v20 }
 0x1b8   :  { %v449_v21 = vpop.f32.mrf.mxu1 }
 0x1b9   :  { %v450_v22 = vadd.f32 %v1175_v53, %v449_v21 }
 0x1ba   :  { %v597_v23 = vpop.f32.mrf.mxu2 }
 0x1bb   :  { %v509_v24 = vmul.f32 0.01, %v450_v22  ;;  %v598_v25 = vadd.f32 %v1212_v6, %v597_v23 }
 0x1bd   :  { %v541_v26 = vmax.f32 %v450_v22, %v509_v24  ;;  %v691_v27 = vmul.f32 0.01, %v598_v25 }
 0x1bf   :  { %647 = vmatmul.f32.gmra.mxu2 %v541_v26  ;;  %v723_v28 = vmax.f32 %v598_v25, %v691_v27 }
 0x1c0   :  { %v452_v29 = vpop.f32.mrf.mxu1 }
 0x1c1   :  { %v453_v30 = vadd.f32 %v1175_v53, %v452_v29  ;;  %795 = vmatmul.f32.gmra.mxu3 %v723_v28 }
 0x1c2   :  { %v600_v31 = vpop.f32.mrf.mxu2 }
 0x1c3   :  { %v510_v32 = vmul.f32 0.01, %v453_v30  ;;  %v601_v33 = vadd.f32 %v1212_v6, %v600_v31 }
 0x1c5   :  { %v542_v34 = vmax.f32 %v453_v30, %v510_v32  ;;  %v692_v35 = vmul.f32 0.01, %v601_v33 }
 0x1c7   :  { %650 = vmatmul.f32.gmra.mxu2 %v542_v34  ;;  %v724_v36 = vmax.f32 %v601_v33, %v692_v35 }
 0x1c8   :  { %v455_v37 = vpop.f32.mrf.mxu1 }
 0x1c9   :  { %v456_v38 = vadd.f32 %v1175_v53, %v455_v37  ;;  %798 = vmatmul.f32.gmra.mxu3 %v724_v36 }
 0x1ca   :  { %v603_v39 = vpop.f32.mrf.mxu2 }
 0x1cb   :  { %v511_v40 = vmul.f32 0.01, %v456_v38  ;;  %v604_v41 = vadd.f32 %v1212_v6, %v603_v39 }
 0x1cd   :  { %v543_v42 = vmax.f32 %v456_v38, %v511_v40  ;;  %v693_v43 = vmul.f32 0.01, %v604_v41 }
 0x1cf   :  { %653 = vmatmul.f32.gmra.mxu2 %v543_v42  ;;  %v725_v44 = vmax.f32 %v604_v41, %v693_v43 }
 0x1d0   :  { %v458_v45 = vpop.f32.mrf.mxu1 }
 0x1d1   :  { %v459_v46 = vadd.f32 %v1175_v53, %v458_v45  ;;  %801 = vmatmul.f32.gmra.mxu3 %v725_v44 }
 0x1d2   :  { %v606_v47 = vpop.f32.mrf.mxu2 }
 0x1d3   :  { %v512_v48 = vmul.f32 0.01, %v459_v46  ;;  %v607_v49 = vadd.f32 %v1212_v6, %v606_v47 }
 0x1d5   :  { %v544_v50 = vmax.f32 %v459_v46, %v512_v48  ;;  %v694_v51 = vmul.f32 0.01, %v607_v49 }
 0x1d7   :  { %656 = vmatmul.f32.gmra.mxu2 %v544_v50  ;;  %v726_v52 = vmax.f32 %v607_v49, %v694_v51 }
 0x1d8   :  { %v461_v54 = vpop.f32.mrf.mxu1 }
 0x1d9   :  { %v462_v55 = vadd.f32 %v1175_v53, %v461_v54  ;;  %804 = vmatmul.f32.gmra.mxu3 %v726_v52 }
 0x1da   :  { %v609_v56 = vpop.f32.mrf.mxu2 }
 0x1db   :  { %v513_v57 = vmul.f32 0.01, %v462_v55  ;;  %v610_v58 = vadd.f32 %v1212_v6, %v609_v56 }
 0x1dd   :  { %v545_v59 = vmax.f32 %v462_v55, %v513_v57  ;;  %v695_v60 = vmul.f32 0.01, %v610_v58 }
 0x1df   :  { %659 = vmatmul.f32.gmra.mxu2 %v545_v59  ;;  %v727_v61 = vmax.f32 %v610_v58, %v695_v60 }
 0x1e0   :  { %v464_v62 = vpop.f32.mrf.mxu1 }
 0x1e1   :  { %v465_v63 = vadd.f32 %v1175_v53, %v464_v62  ;;  %807 = vmatmul.f32.gmra.mxu3 %v727_v61 }
 0x1e2   :  { %v612_v0 = vpop.f32.mrf.mxu2 }
 0x1e3   :  { %v514_v1 = vmul.f32 0.01, %v465_v63  ;;  %v613_v2 = vadd.f32 %v1212_v6, %v612_v0 }
 0x1e5   :  { %v546_v3 = vmax.f32 %v465_v63, %v514_v1  ;;  %v696_v4 = vmul.f32 0.01, %v613_v2 }
 0x1e7   :  { %662 = vmatmul.f32.gmra.mxu2 %v546_v3  ;;  %v728_v5 = vmax.f32 %v613_v2, %v696_v4 }
 0x1e8   :  { %v467_v7 = vpop.f32.mrf.mxu1 }
 0x1e9   :  { %v468_v8 = vadd.f32 %v1175_v53, %v467_v7  ;;  %810 = vmatmul.f32.gmra.mxu3 %v728_v5 }
 0x1ea   :  { %v615_v9 = vpop.f32.mrf.mxu2 }
 0x1eb   :  { %v515_v10 = vmul.f32 0.01, %v468_v8  ;;  %v616_v11 = vadd.f32 %v1212_v6, %v615_v9 }
 0x1ed   :  { %v547_v12 = vmax.f32 %v468_v8, %v515_v10  ;;  %v697_v13 = vmul.f32 0.01, %v616_v11 }
 0x1ef   :  { %665 = vmatmul.f32.gmra.mxu2 %v547_v12  ;;  %v729_v14 = vmax.f32 %v616_v11, %v697_v13 }
 0x1f0   :  { %v470_v15 = vpop.f32.mrf.mxu1 }
 0x1f1   :  { %v471_v16 = vadd.f32 %v1175_v53, %v470_v15  ;;  %813 = vmatmul.f32.gmra.mxu3 %v729_v14 }
 0x1f2   :  { %v618_v17 = vpop.f32.mrf.mxu2 }
 0x1f3   :  { %v516_v18 = vmul.f32 0.01, %v471_v16  ;;  %v619_v19 = vadd.f32 %v1212_v6, %v618_v17 }
 0x1f5   :  { %v548_v20 = vmax.f32 %v471_v16, %v516_v18  ;;  %v698_v21 = vmul.f32 0.01, %v619_v19  ;;  %v1249_v16 = vld [vmem:[%s1428_s2 + $0x3] ss:$0 sm:$0xff] }
 0x1f7   :  { %668 = vmatmul.f32.gmra.mxu2 %v548_v20  ;;  %v730_v22 = vmax.f32 %v619_v19, %v698_v21 }
 0x1f8   :  { %v473_v23 = vpop.f32.mrf.mxu1 }
 0x1f9   :  { %v474_v24 = vadd.f32 %v1175_v53, %v473_v23  ;;  %816 = vmatmul.f32.gmra.mxu3 %v730_v22 }
 0x1fa   :  { %v621_v25 = vpop.f32.mrf.mxu2 }
 0x1fb   :  { %v517_v26 = vmul.f32 0.01, %v474_v24  ;;  %v622_v27 = vadd.f32 %v1212_v6, %v621_v25 }
 0x1fd   :  { %v549_v28 = vmax.f32 %v474_v24, %v517_v26  ;;  %v699_v29 = vmul.f32 0.01, %v622_v27 }
 0x1ff   :  { %671 = vmatmul.f32.gmra.mxu2 %v549_v28  ;;  %v731_v30 = vmax.f32 %v622_v27, %v699_v29 }
 0x200   :  { %v476_v31 = vpop.f32.mrf.mxu1 }
 0x201   :  { %v477_v32 = vadd.f32 %v1175_v53, %v476_v31  ;;  %819 = vmatmul.f32.gmra.mxu3 %v731_v30 }
 0x202   :  { %v624_v33 = vpop.f32.mrf.mxu2 }
 0x203   :  { %v518_v34 = vmul.f32 0.01, %v477_v32  ;;  %v625_v35 = vadd.f32 %v1212_v6, %v624_v33 }
 0x205   :  { %v550_v36 = vmax.f32 %v477_v32, %v518_v34  ;;  %v700_v37 = vmul.f32 0.01, %v625_v35 }
 0x207   :  { %674 = vmatmul.f32.gmra.mxu2 %v550_v36  ;;  %v732_v38 = vmax.f32 %v625_v35, %v700_v37 }
 0x208   :  { %v479_v39 = vpop.f32.mrf.mxu1 }
 0x209   :  { %v480_v40 = vadd.f32 %v1175_v53, %v479_v39  ;;  %822 = vmatmul.f32.gmra.mxu3 %v732_v38 }
 0x20a   :  { %v627_v41 = vpop.f32.mrf.mxu2 }
 0x20b   :  { %v519_v42 = vmul.f32 0.01, %v480_v40  ;;  %v628_v43 = vadd.f32 %v1212_v6, %v627_v41 }
 0x20d   :  { %v551_v44 = vmax.f32 %v480_v40, %v519_v42  ;;  %v701_v45 = vmul.f32 0.01, %v628_v43 }
 0x20f   :  { %677 = vmatmul.f32.gmra.mxu2 %v551_v44  ;;  %v733_v46 = vmax.f32 %v628_v43, %v701_v45 }
 0x210   :  { %v482_v47 = vpop.f32.mrf.mxu1 }
 0x211   :  { %v483_v48 = vadd.f32 %v1175_v53, %v482_v47  ;;  %825 = vmatmul.f32.gmra.mxu3 %v733_v46 }
 0x212   :  { %v630_v49 = vpop.f32.mrf.mxu2 }
 0x213   :  { %v520_v50 = vmul.f32 0.01, %v483_v48  ;;  %v631_v51 = vadd.f32 %v1212_v6, %v630_v49 }
 0x215   :  { %v552_v52 = vmax.f32 %v483_v48, %v520_v50  ;;  %v702_v54 = vmul.f32 0.01, %v631_v51 }
 0x217   :  { %680 = vmatmul.f32.gmra.mxu2 %v552_v52  ;;  %v734_v55 = vmax.f32 %v631_v51, %v702_v54 }
 0x218   :  { %v485_v56 = vpop.f32.mrf.mxu1 }
 0x219   :  { %v486_v57 = vadd.f32 %v1175_v53, %v485_v56  ;;  %828 = vmatmul.f32.gmra.mxu3 %v734_v55 }
 0x21a   :  { %v633_v58 = vpop.f32.mrf.mxu2 }
 0x21b   :  { %v521_v59 = vmul.f32 0.01, %v486_v57  ;;  %v634_v60 = vadd.f32 %v1212_v6, %v633_v58 }
 0x21d   :  { %v553_v61 = vmax.f32 %v486_v57, %v521_v59  ;;  %v703_v62 = vmul.f32 0.01, %v634_v60 }
 0x21f   :  { %683 = vmatmul.f32.gmra.mxu2 %v553_v61  ;;  %v735_v63 = vmax.f32 %v634_v60, %v703_v62 }
 0x220   :  { %v488_v0 = vpop.f32.mrf.mxu1 }
 0x221   :  { %v489_v1 = vadd.f32 %v1175_v53, %v488_v0  ;;  %831 = vmatmul.f32.gmra.mxu3 %v735_v63 }
 0x222   :  { %v636_v2 = vpop.f32.mrf.mxu2 }
 0x223   :  { %v522_v3 = vmul.f32 0.01, %v489_v1  ;;  %v637_v4 = vadd.f32 %v1212_v6, %v636_v2 }
 0x225   :  { %v554_v5 = vmax.f32 %v489_v1, %v522_v3  ;;  %v704_v7 = vmul.f32 0.01, %v637_v4 }
 0x227   :  { %686 = vmatmul.f32.gmra.mxu2 %v554_v5  ;;  %v736_v8 = vmax.f32 %v637_v4, %v704_v7 }
 0x229   :  { %834 = vmatmul.f32.gmra.mxu3 %v736_v8 }
 0x22a   :  { %v639_v9 = vpop.f32.mrf.mxu2 }
 0x22b   :  { %v640_v10 = vadd.f32 %v1212_v6, %v639_v9 }
 0x22d   :  { %v705_v11 = vmul.f32 0.01, %v640_v10 }
 0x22f   :  { %v737_v12 = vmax.f32 %v640_v10, %v705_v11 }
 0x231   :  { %837 = vmatmul.f32.gmra.mxu3 %v737_v12 }
 0x232   :  { %v642_v13 = vpop.f32.mrf.mxu2 }
 0x233   :  { %v643_v14 = vadd.f32 %v1212_v6, %v642_v13 }
 0x235   :  { %v706_v53 = vmul.f32 0.01, %v643_v14 }
 0x237   :  { %v738_v15 = vmax.f32 %v643_v14, %v706_v53 }
 0x239   :  { %840 = vmatmul.f32.gmra.mxu3 %v738_v15 }
 0x23a   :  { %v645_v17 = vpop.f32.mrf.mxu2  ;;  %v793_v19 = vpop.f32.mrf.mxu3 }
 0x23b   :  { %v646_v18 = vadd.f32 %v1212_v6, %v645_v17  ;;  %v794_v21 = vadd.f32 %v1249_v16, %v793_v19 }
 0x23d   :  { %v707_v20 = vmul.f32 0.01, %v646_v18  ;;  %889 = vst.msk [vmem:[%s1429_s3] sm:$0xff] %vm94_vm0, %v794_v21 }
 0x23f   :  { %v739_v22 = vmax.f32 %v646_v18, %v707_v20 }
 0x241   :  { %843 = vmatmul.f32.gmra.mxu3 %v739_v22 }
 0x242   :  { %v648_v23 = vpop.f32.mrf.mxu2 }
 0x243   :  { %v649_v24 = vadd.f32 %v1212_v6, %v648_v23 }
 0x244   :  { %v796_v25 = vpop.f32.mrf.mxu3 }
 0x245   :  { %v708_v26 = vmul.f32 0.01, %v649_v24  ;;  %v797_v27 = vadd.f32 %v1249_v16, %v796_v25 }
 0x247   :  { %890 = vst.msk [vmem:[%s1429_s3 + $0x8] sm:$0xff] %vm94_vm0, %v797_v27  ;;  %v740_v28 = vmax.f32 %v649_v24, %v708_v26 }
 0x249   :  { %846 = vmatmul.f32.gmra.mxu3 %v740_v28 }
 0x24a   :  { %v651_v29 = vpop.f32.mrf.mxu2 }
 0x24b   :  { %v652_v30 = vadd.f32 %v1212_v6, %v651_v29 }
 0x24c   :  { %v799_v31 = vpop.f32.mrf.mxu3 }
 0x24d   :  { %v709_v32 = vmul.f32 0.01, %v652_v30  ;;  %v800_v33 = vadd.f32 %v1249_v16, %v799_v31 }
 0x24f   :  { %891 = vst.msk [vmem:[%s1429_s3 + $0x10] sm:$0xff] %vm94_vm0, %v800_v33  ;;  %v741_v34 = vmax.f32 %v652_v30, %v709_v32 }
 0x251   :  { %849 = vmatmul.f32.gmra.mxu3 %v741_v34 }
 0x252   :  { %v654_v35 = vpop.f32.mrf.mxu2 }
 0x253   :  { %v655_v36 = vadd.f32 %v1212_v6, %v654_v35 }
 0x254   :  { %v802_v37 = vpop.f32.mrf.mxu3 }
 0x255   :  { %v710_v38 = vmul.f32 0.01, %v655_v36  ;;  %v803_v39 = vadd.f32 %v1249_v16, %v802_v37 }
 0x257   :  { %892 = vst.msk [vmem:[%s1429_s3 + $0x18] sm:$0xff] %vm94_vm0, %v803_v39  ;;  %v742_v40 = vmax.f32 %v655_v36, %v710_v38 }
 0x259   :  { %852 = vmatmul.f32.gmra.mxu3 %v742_v40 }
 0x25a   :  { %v657_v41 = vpop.f32.mrf.mxu2 }
 0x25b   :  { %v658_v42 = vadd.f32 %v1212_v6, %v657_v41 }
 0x25c   :  { %v805_v43 = vpop.f32.mrf.mxu3 }
 0x25d   :  { %v711_v44 = vmul.f32 0.01, %v658_v42  ;;  %v806_v45 = vadd.f32 %v1249_v16, %v805_v43 }
 0x25f   :  { %893 = vst.msk [vmem:[%s1429_s3 + $0x20] sm:$0xff] %vm94_vm0, %v806_v45  ;;  %v743_v46 = vmax.f32 %v658_v42, %v711_v44 }
 0x261   :  { %855 = vmatmul.f32.gmra.mxu3 %v743_v46 }
 0x262   :  { %v660_v47 = vpop.f32.mrf.mxu2 }
 0x263   :  { %v661_v48 = vadd.f32 %v1212_v6, %v660_v47 }
 0x264   :  { %v808_v49 = vpop.f32.mrf.mxu3 }
 0x265   :  { %v712_v50 = vmul.f32 0.01, %v661_v48  ;;  %v809_v51 = vadd.f32 %v1249_v16, %v808_v49 }
 0x267   :  { %894 = vst.msk [vmem:[%s1429_s3 + $0x28] sm:$0xff] %vm94_vm0, %v809_v51  ;;  %v744_v52 = vmax.f32 %v661_v48, %v712_v50 }
 0x269   :  { %858 = vmatmul.f32.gmra.mxu3 %v744_v52 }
 0x26a   :  { %v663_v54 = vpop.f32.mrf.mxu2 }
 0x26b   :  { %v664_v55 = vadd.f32 %v1212_v6, %v663_v54 }
 0x26c   :  { %v811_v56 = vpop.f32.mrf.mxu3 }
 0x26d   :  { %v713_v57 = vmul.f32 0.01, %v664_v55  ;;  %v812_v58 = vadd.f32 %v1249_v16, %v811_v56 }
 0x26f   :  { %895 = vst.msk [vmem:[%s1429_s3 + $0x30] sm:$0xff] %vm94_vm0, %v812_v58  ;;  %v745_v59 = vmax.f32 %v664_v55, %v713_v57 }
 0x271   :  { %861 = vmatmul.f32.gmra.mxu3 %v745_v59 }
 0x272   :  { %v666_v60 = vpop.f32.mrf.mxu2 }
 0x273   :  { %v667_v61 = vadd.f32 %v1212_v6, %v666_v60 }
 0x274   :  { %v814_v62 = vpop.f32.mrf.mxu3 }
 0x275   :  { %v714_v63 = vmul.f32 0.01, %v667_v61  ;;  %v815_v0 = vadd.f32 %v1249_v16, %v814_v62 }
 0x277   :  { %v746_v1 = vmax.f32 %v667_v61, %v714_v63  ;;  %896 = vst.msk [vmem:[%s1429_s3 + $0x38] sm:$0xff] %vm94_vm0, %v815_v0 }
 0x279   :  { %864 = vmatmul.f32.gmra.mxu3 %v746_v1 }
 0x27a   :  { %v669_v2 = vpop.f32.mrf.mxu2 }
 0x27b   :  { %v670_v3 = vadd.f32 %v1212_v6, %v669_v2 }
 0x27c   :  { %v817_v4 = vpop.f32.mrf.mxu3 }
 0x27d   :  { %v715_v5 = vmul.f32 0.01, %v670_v3  ;;  %v818_v7 = vadd.f32 %v1249_v16, %v817_v4 }
 0x27f   :  { %v747_v8 = vmax.f32 %v670_v3, %v715_v5  ;;  %897 = vst.msk [vmem:[%s1429_s3 + $0x40] sm:$0xff] %vm94_vm0, %v818_v7 }
 0x281   :  { %867 = vmatmul.f32.gmra.mxu3 %v747_v8 }
 0x282   :  { %v672_v9 = vpop.f32.mrf.mxu2 }
 0x283   :  { %v673_v10 = vadd.f32 %v1212_v6, %v672_v9 }
 0x284   :  { %v820_v11 = vpop.f32.mrf.mxu3 }
 0x285   :  { %v716_v12 = vmul.f32 0.01, %v673_v10  ;;  %v821_v13 = vadd.f32 %v1249_v16, %v820_v11 }
 0x287   :  { %v748_v14 = vmax.f32 %v673_v10, %v716_v12  ;;  %898 = vst.msk [vmem:[%s1429_s3 + $0x48] sm:$0xff] %vm94_vm0, %v821_v13 }
 0x289   :  { %870 = vmatmul.f32.gmra.mxu3 %v748_v14 }
 0x28a   :  { %v675_v53 = vpop.f32.mrf.mxu2 }
 0x28b   :  { %v676_v15 = vadd.f32 %v1212_v6, %v675_v53 }
 0x28c   :  { %v823_v17 = vpop.f32.mrf.mxu3 }
 0x28d   :  { %v717_v18 = vmul.f32 0.01, %v676_v15  ;;  %v824_v19 = vadd.f32 %v1249_v16, %v823_v17 }
 0x28f   :  { %v749_v20 = vmax.f32 %v676_v15, %v717_v18  ;;  %899 = vst.msk [vmem:[%s1429_s3 + $0x50] sm:$0xff] %vm94_vm0, %v824_v19 }
 0x291   :  { %873 = vmatmul.f32.gmra.mxu3 %v749_v20 }
 0x292   :  { %v678_v21 = vpop.f32.mrf.mxu2 }
 0x293   :  { %v679_v22 = vadd.f32 %v1212_v6, %v678_v21 }
 0x294   :  { %v826_v23 = vpop.f32.mrf.mxu3 }
 0x295   :  { %v718_v24 = vmul.f32 0.01, %v679_v22  ;;  %v827_v25 = vadd.f32 %v1249_v16, %v826_v23 }
 0x297   :  { %v750_v26 = vmax.f32 %v679_v22, %v718_v24  ;;  %900 = vst.msk [vmem:[%s1429_s3 + $0x58] sm:$0xff] %vm94_vm0, %v827_v25 }
 0x299   :  { %876 = vmatmul.f32.gmra.mxu3 %v750_v26 }
 0x29a   :  { %v681_v27 = vpop.f32.mrf.mxu2 }
 0x29b   :  { %v682_v28 = vadd.f32 %v1212_v6, %v681_v27 }
 0x29c   :  { %v829_v29 = vpop.f32.mrf.mxu3 }
 0x29d   :  { %v719_v30 = vmul.f32 0.01, %v682_v28  ;;  %v830_v31 = vadd.f32 %v1249_v16, %v829_v29 }
 0x29f   :  { %v751_v32 = vmax.f32 %v682_v28, %v719_v30  ;;  %901 = vst.msk [vmem:[%s1429_s3 + $0x60] sm:$0xff] %vm94_vm0, %v830_v31 }
 0x2a1   :  { %879 = vmatmul.f32.gmra.mxu3 %v751_v32 }
 0x2a2   :  { %v684_v33 = vpop.f32.mrf.mxu2 }
 0x2a3   :  { %v685_v34 = vadd.f32 %v1212_v6, %v684_v33 }
 0x2a4   :  { %v832_v35 = vpop.f32.mrf.mxu3 }
 0x2a5   :  { %v720_v36 = vmul.f32 0.01, %v685_v34  ;;  %v833_v37 = vadd.f32 %v1249_v16, %v832_v35 }
 0x2a7   :  { %v752_v38 = vmax.f32 %v685_v34, %v720_v36  ;;  %902 = vst.msk [vmem:[%s1429_s3 + $0x68] sm:$0xff] %vm94_vm0, %v833_v37 }
 0x2a9   :  { %882 = vmatmul.f32.gmra.mxu3 %v752_v38 }
 0x2aa   :  { %v687_v39 = vpop.f32.mrf.mxu2 }
 0x2ab   :  { %v688_v40 = vadd.f32 %v1212_v6, %v687_v39 }
 0x2ac   :  { %v835_v41 = vpop.f32.mrf.mxu3 }
 0x2ad   :  { %v721_v42 = vmul.f32 0.01, %v688_v40  ;;  %v836_v43 = vadd.f32 %v1249_v16, %v835_v41 }
 0x2af   :  { %v753_v44 = vmax.f32 %v688_v40, %v721_v42  ;;  %903 = vst.msk [vmem:[%s1429_s3 + $0x70] sm:$0xff] %vm94_vm0, %v836_v43 }
 0x2b1   :  { %885 = vmatmul.f32.gmra.mxu3 %v753_v44 }
 0x2b4   :  { %v838_v45 = vpop.f32.mrf.mxu3 }
 0x2b5   :  { %v839_v46 = vadd.f32 %v1249_v16, %v838_v45 }
 0x2b7   :  { %904 = vst.msk [vmem:[%s1429_s3 + $0x78] sm:$0xff] %vm94_vm0, %v839_v46 }
 0x2bc   :  { %v841_v6 = vpop.f32.mrf.mxu3 }
 0x2bd   :  { %v842_v47 = vadd.f32 %v1249_v16, %v841_v6 }
 0x2bf   :  { %905 = vst.msk [vmem:[%s1429_s3 + $0x80] sm:$0xff] %vm94_vm0, %v842_v47 }
 0x2c4   :  { %v844_v48 = vpop.f32.mrf.mxu3 }
 0x2c5   :  { %v845_v49 = vadd.f32 %v1249_v16, %v844_v48 }
 0x2c7   :  { %906 = vst.msk [vmem:[%s1429_s3 + $0x88] sm:$0xff] %vm94_vm0, %v845_v49 }
 0x2cc   :  { %v847_v50 = vpop.f32.mrf.mxu3 }
 0x2cd   :  { %v848_v51 = vadd.f32 %v1249_v16, %v847_v50 }
 0x2cf   :  { %907 = vst.msk [vmem:[%s1429_s3 + $0x90] sm:$0xff] %vm94_vm0, %v848_v51 }
 0x2d4   :  { %v850_v52 = vpop.f32.mrf.mxu3 }
 0x2d5   :  { %v851_v54 = vadd.f32 %v1249_v16, %v850_v52 }
 0x2d7   :  { %908 = vst.msk [vmem:[%s1429_s3 + $0x98] sm:$0xff] %vm94_vm0, %v851_v54 }
 0x2dc   :  { %v853_v55 = vpop.f32.mrf.mxu3 }
 0x2dd   :  { %v854_v56 = vadd.f32 %v1249_v16, %v853_v55 }
 0x2df   :  { %909 = vst.msk [vmem:[%s1429_s3 + $0xa0] sm:$0xff] %vm94_vm0, %v854_v56 }
 0x2e4   :  { %v856_v57 = vpop.f32.mrf.mxu3 }
 0x2e5   :  { %v857_v58 = vadd.f32 %v1249_v16, %v856_v57 }
 0x2e7   :  { %910 = vst.msk [vmem:[%s1429_s3 + $0xa8] sm:$0xff] %vm94_vm0, %v857_v58 }
 0x2ec   :  { %v859_v59 = vpop.f32.mrf.mxu3 }
 0x2ed   :  { %v860_v60 = vadd.f32 %v1249_v16, %v859_v59 }
 0x2ef   :  { %911 = vst.msk [vmem:[%s1429_s3 + $0xb0] sm:$0xff] %vm94_vm0, %v860_v60 }
 0x2f4   :  { %v862_v61 = vpop.f32.mrf.mxu3 }
 0x2f5   :  { %v863_v62 = vadd.f32 %v1249_v16, %v862_v61 }
 0x2f7   :  { %912 = vst.msk [vmem:[%s1429_s3 + $0xb8] sm:$0xff] %vm94_vm0, %v863_v62 }
 0x2fc   :  { %v865_v63 = vpop.f32.mrf.mxu3 }
 0x2fd   :  { %v866_v0 = vadd.f32 %v1249_v16, %v865_v63 }
 0x2ff   :  { %913 = vst.msk [vmem:[%s1429_s3 + $0xc0] sm:$0xff] %vm94_vm0, %v866_v0 }
 0x304   :  { %v868_v1 = vpop.f32.mrf.mxu3 }
 0x305   :  { %v869_v2 = vadd.f32 %v1249_v16, %v868_v1 }
 0x307   :  { %914 = vst.msk [vmem:[%s1429_s3 + $0xc8] sm:$0xff] %vm94_vm0, %v869_v2 }
 0x30c   :  { %v871_v3 = vpop.f32.mrf.mxu3 }
 0x30d   :  { %v872_v4 = vadd.f32 %v1249_v16, %v871_v3 }
 0x30f   :  { %915 = vst.msk [vmem:[%s1429_s3 + $0xd0] sm:$0xff] %vm94_vm0, %v872_v4 }
 0x314   :  { %v874_v5 = vpop.f32.mrf.mxu3 }
 0x315   :  { %v875_v7 = vadd.f32 %v1249_v16, %v874_v5 }
 0x317   :  { %916 = vst.msk [vmem:[%s1429_s3 + $0xd8] sm:$0xff] %vm94_vm0, %v875_v7 }
 0x31c   :  { %v877_v8 = vpop.f32.mrf.mxu3 }
 0x31d   :  { %v878_v9 = vadd.f32 %v1249_v16, %v877_v8 }
 0x31f   :  { %917 = vst.msk [vmem:[%s1429_s3 + $0xe0] sm:$0xff] %vm94_vm0, %v878_v9 }
 0x324   :  { %v880_v10 = vpop.f32.mrf.mxu3 }
 0x325   :  { %v881_v11 = vadd.f32 %v1249_v16, %v880_v10 }
 0x327   :  { %918 = vst.msk [vmem:[%s1429_s3 + $0xe8] sm:$0xff] %vm94_vm0, %v881_v11 }
 0x32c   :  { %v883_v12 = vpop.f32.mrf.mxu3 }
 0x32d   :  { %v884_v13 = vadd.f32 %v1249_v16, %v883_v12 }
 0x32f   :  { %919 = vst.msk [vmem:[%s1429_s3 + $0xf0] sm:$0xff] %vm94_vm0, %v884_v13 }
 0x334   :  { %v886_v14 = vpop.f32.mrf.mxu3 }
 0x335   :  { %v887_v53 = vadd.f32 %v1249_v16, %v886_v14 }
 0x337   :  { %920 = vst.msk [vmem:[%s1429_s3 + $0xf8] sm:$0xff] %vm94_vm0, %v887_v53 }
 0x338   :  { %925 = vsyncpa [#allocation4], 1 }

</bundles_post_ra>
